<compile_context>
chip_gen: v7x
topology: tpu7x:2x2x1
jax: 0.10.0
libtpu: 0.0.40
codegen_flags: <defaults>
</compile_context>

<pallas_src>
from functools import partial

import numpy as np
import jax
import jax.numpy as jnp
from jax.experimental import pallas as pl
from jax.experimental.pallas import tpu as pltpu


# ----------------------------- fused Pallas kernel --------------------------

def _make_fused_kernel(B, S, C, F, nclass):
    """conv-GEMM + PReLU + FC + PReLU + merged heads + log-softmax, one kernel."""
    offs = [int(v) for v in np.cumsum([0] + list(nclass))]
    NH = offs[-1]

    def kernel(p_ref, w1_ref, ba1_ref, w2e_ref, wh_ref, ba2h_ref, *o_refs):
        # ---- conv as GEMM + bias + per-channel PReLU ------------------------
        y = jnp.dot(p_ref[...], w1_ref[...], preferred_element_type=jnp.float32)
        y = y + ba1_ref[0:1, :]                              # bias   (1, C)
        y = jnp.where(y > 0.0, y, ba1_ref[1:2, :] * y)       # PReLU  (B*S, C)

        # ---- FC without any relayout ---------------------------------------
        # z[m, f] = sum_c y[m, c] * fc_w[c*S + (m % S), f]
        # (w2e pre-blocked host-side as (B*S, C*F): lane block c holds that
        #  channel's (S, F) weight slab, tiled over the batch.)
        w2e = w2e_ref[...]
        z = y[:, 0:1] * w2e[:, 0:F]
        for c in range(1, C):                                # static unroll (C=8)
            z = z + y[:, c:c + 1] * w2e[:, c * F:(c + 1) * F]

        # per-batch segment sum over the B*S rows as a tiny selector matmul
        col = jax.lax.broadcasted_iota(jnp.int32, (B, B * S), 1)
        row = jax.lax.broadcasted_iota(jnp.int32, (B, B * S), 0)
        sel = jnp.where((col >= row * S) & (col < (row + 1) * S), 1.0, 0.0)
        h = jnp.dot(sel, z, preferred_element_type=jnp.float32)   # (B, F)

        h = h + ba2h_ref[0:1, :]                             # fc bias
        h = jnp.where(h > 0.0, h, ba2h_ref[1:2, :] * h)      # fc PReLU

        # ---- both class heads as ONE matmul + per-head log-softmax ---------
        g = jnp.dot(h, wh_ref[...], preferred_element_type=jnp.float32)
        g = g + ba2h_ref[2:3, 0:NH]                          # heads bias (padded row)
        for i, o_ref in enumerate(o_refs):                   # static unroll (2)
            zi = g[:, offs[i]:offs[i + 1]]                   # static lane slice
            m = jnp.max(zi, axis=1, keepdims=True)
            zs = zi - m
            lse = jnp.log(jnp.sum(jnp.exp(zs), axis=1, keepdims=True))
            o_ref[...] = zs - lse

    return kernel


def stage1_fused_call(patches, w1, ba1, w2e, wh, ba2h, *, B, S, C, F, nclass):
    K = patches.shape[1]
    NH = wh.shape[1]
    M = B * S
    kernel = _make_fused_kernel(B, S, C, F, tuple(nclass))
    cost = pl.CostEstimate(
        flops=2 * (M * K * C + M * C * F + B * M * F + B * F * NH),
        transcendentals=B * NH + B * len(nclass),
        bytes_accessed=4 * (patches.size + w1.size + ba1.size + w2e.size
                            + wh.size + ba2h.size + B * NH),
    )
    vmem = pltpu.MemorySpace.VMEM
    return pl.pallas_call(
        kernel,
        out_shape=tuple(jax.ShapeDtypeStruct((B, n), jnp.float32) for n in nclass),
        in_specs=[pl.BlockSpec(memory_space=vmem) for _ in range(6)],
        out_specs=tuple(pl.BlockSpec(memory_space=vmem) for _ in nclass),
        cost_estimate=cost,
    )(patches, w1, ba1, w2e, wh, ba2h)


# ------------------------------- glue (JAX) ---------------------------------

def get_paddings(size, num_levels):
    paddings = []
    for _ in range(num_levels - 1):
        if size % 4 == 2:
            paddings.append(1)
            size = size // 2 + 1
        else:
            paddings.append(0)
            size //= 2
    if num_levels > 0:
        paddings.append(0)
        size //= 2
    return size, paddings


def im2col_nchw(x, k, stride, pad):
    """x: (B, C, H, W) -> (B*OH*OW, C*k*k), patch features ordered (C, KH, KW)."""
    B, C, H, W = x.shape
    xp = jnp.pad(x, ((0, 0), (0, 0), (pad, pad), (pad, pad)))
    OH = (H + 2 * pad - k) // stride + 1
    OW = (W + 2 * pad - k) // stride + 1
    cols = []
    for kh in range(k):
        for kw in range(k):
            cols.append(xp[:, :, kh:kh + stride * OH:stride, kw:kw + stride * OW:stride])
    p = jnp.stack(cols, axis=2)                  # (B, C, k*k, OH, OW)
    p = p.reshape(B, C * k * k, OH, OW)          # feature idx = c*k*k + kh*k + kw
    p = p.transpose(0, 2, 3, 1).reshape(B * OH * OW, C * k * k)   # rows = (b, oh, ow)
    return p, OH, OW


def prepare_pallas_params(raw, *, top_size, batch):
    """One-time host-side weight re-layout so the runtime path has no transposes."""
    cw = raw["conv_w"]                                  # (Cout, Cin, k, k) torch OIHW
    Cout = cw.shape[0]
    S = top_size * top_size
    w1 = cw.reshape(Cout, -1).T                         # (Cin*k*k, Cout)
    ba1 = jnp.concatenate([raw["conv_b"], raw["conv_alpha"]], axis=0)      # (2, Cout)
    fcw = raw["fc_w"]                                   # (Cout*S, F), torch row c*S+s
    F = fcw.shape[1]
    # w2blk[s, c*F+f] = fc_w[c*S+s, f]; tile over batch -> w2e[m, c*F+f]
    w2blk = fcw.reshape(Cout, S, F).transpose(1, 0, 2).reshape(S, Cout * F)
    w2e = jnp.tile(w2blk, (batch, 1))                   # (batch*S, Cout*F)
    wh = jnp.concatenate([w for (w, _) in raw["heads"]], axis=1)           # (F, NH)
    bh = jnp.concatenate([b for (_, b) in raw["heads"]], axis=1)           # (1, NH)
    NH = bh.shape[1]
    bh_pad = jnp.pad(bh, ((0, 0), (0, F - NH)))
    ba2h = jnp.concatenate([raw["fc_b"], raw["fc_alpha"], bh_pad], axis=0)  # (3, F)
    return {"w1": w1, "ba1": ba1, "w2e": w2e, "wh": wh, "ba2h": ba2h}


def stage1_forward(x, p, *, pad, k, stride, nclass):
    B = x.shape[0]
    patches, OH, OW = im2col_nchw(x, k=k, stride=stride, pad=pad)
    S = OH * OW
    C = p["w1"].shape[1]
    F = p["ba2h"].shape[1]
    return stage1_fused_call(patches, p["w1"], p["ba1"], p["w2e"], p["wh"], p["ba2h"],
                             B=B, S=S, C=C, F=F, nclass=nclass)


def stage1_forward_ref(x, raw, *, pad, k, stride):
    """Pure-JAX reference mimicking the torch module exactly (NCHW flatten order)."""
    B = x.shape[0]
    patches, OH, OW = im2col_nchw(x, k=k, stride=stride, pad=pad)
    cw = raw["conv_w"]
    Cout = cw.shape[0]
    hp = jax.lax.Precision.HIGHEST

    def prelu(z, a):
        return jnp.where(z > 0, z, a * z)

    z = prelu(jnp.dot(patches, cw.reshape(Cout, -1).T, precision=hp) + raw["conv_b"],
              raw["conv_alpha"])
    # torch: conv output NCHW then x.reshape(B, -1)  (C, H, W order)
    x2 = z.reshape(B, OH, OW, Cout).transpose(0, 3, 1, 2).reshape(B, -1)
    h = prelu(jnp.dot(x2, raw["fc_w"], precision=hp) + raw["fc_b"], raw["fc_alpha"])
    outs = []
    for wc, bc in raw["heads"]:
        g = jnp.dot(h, wc, precision=hp) + bc
        outs.append(jax.nn.log_softmax(g, axis=1))
    return outs


# --------------------------------- main --------------------------------------

if __name__ == "__main__":
    # Module hyper-params.
    in_size, in_channels = 16, 4
    conv_channels, conv_layers = [8], [1]
    fc_features, fc_layers = 32, 0
    nclass = (5, 3)
    B = 2
    k, stride = 6, 2

    top_size, paddings = get_paddings(in_size, len(conv_channels))  # -> 8, [0]
    c1 = conv_channels[0]
    S = top_size * top_size
    fc_in = c1 * S
    pad = 2 + paddings[0]

    key = jax.random.PRNGKey(0)
    ks = jax.random.split(key, 11)

    raw = {
        "conv_w": 0.1 * jax.random.normal(ks[0], (c1, in_channels, k, k), jnp.float32),
        "conv_b": 0.1 * jax.random.normal(ks[1], (1, c1), jnp.float32),
        "conv_alpha": 0.25 + 0.05 * jax.random.normal(ks[2], (1, c1), jnp.float32),
        "fc_w": 0.05 * jax.random.normal(ks[3], (fc_in, fc_features), jnp.float32),
        "fc_b": 0.1 * jax.random.normal(ks[4], (1, fc_features), jnp.float32),
        "fc_alpha": 0.25 + 0.05 * jax.random.normal(ks[5], (1, fc_features), jnp.float32),
        "heads": [
            (0.1 * jax.random.normal(ks[6], (fc_features, nclass[0]), jnp.float32),
             0.1 * jax.random.normal(ks[7], (1, nclass[0]), jnp.float32)),
            (0.1 * jax.random.normal(ks[8], (fc_features, nclass[1]), jnp.float32),
             0.1 * jax.random.normal(ks[9], (1, nclass[1]), jnp.float32)),
        ],
    }
    pparams = prepare_pallas_params(raw, top_size=top_size, batch=B)

    x = jax.random.normal(ks[10], (B, in_channels, in_size, in_size), jnp.float32)

    fwd = jax.jit(partial(stage1_forward, pad=pad, k=k, stride=stride, nclass=nclass))
    outs = fwd(x, pparams)
    outs = [jax.block_until_ready(o) for o in outs]

    # Validate against the pure-JAX / torch-faithful reference.
    refs = stage1_forward_ref(x, raw, pad=pad, k=k, stride=stride)
    for o, r, m in zip(outs, refs, nclass):
        assert o.shape == (B, m), o.shape
        np.testing.assert_allclose(np.asarray(o), np.asarray(r), rtol=1e-3, atol=1e-3)
        # log_softmax rows must exponentiate-sum to 1.
        np.testing.assert_allclose(np.exp(np.asarray(o)).sum(axis=1),
                                   np.ones(B), rtol=1e-4, atol=1e-4)

    print("KERNEL_OK")
</pallas_src>

<mosaic_0001>
module attributes {stable_mosaic.version = 11 : i64} {
  func.func @kernel(%arg0: memref<128x144xf32, #tpu.memory_space<vmem>>, %arg1: memref<144x8xf32, #tpu.memory_space<vmem>>, %arg2: memref<2x8xf32, #tpu.memory_space<vmem>>, %arg3: memref<128x256xf32, #tpu.memory_space<vmem>>, %arg4: memref<32x8xf32, #tpu.memory_space<vmem>>, %arg5: memref<3x32xf32, #tpu.memory_space<vmem>>, %arg6: memref<2x5xf32, #tpu.memory_space<vmem>>, %arg7: memref<2x3xf32, #tpu.memory_space<vmem>>) attributes {dimension_semantics = [], scalar_prefetch = 0 : i64, scratch_operands = 0 : i64, tpu.core_type = #tpu.core_type<tc>} {
    %c0 = arith.constant 0 : index
    %c0_0 = arith.constant 0 : index
    %0 = vector.load %arg0[%c0, %c0_0] : memref<128x144xf32, #tpu.memory_space<vmem>>, vector<128x144xf32>
    %c0_1 = arith.constant 0 : index
    %c0_2 = arith.constant 0 : index
    %1 = vector.load %arg1[%c0_1, %c0_2] : memref<144x8xf32, #tpu.memory_space<vmem>>, vector<144x8xf32>
    %cst = arith.constant dense<0.000000e+00> : vector<128x8xf32>
    %2 = tpu.matmul %0, %1, %cst {dimension_numbers = #tpu.dot_dimension_numbers<[1], [0], [0], [1], [0, 0, 1, 1], [], []>} : vector<128x144xf32>, vector<144x8xf32>, vector<128x8xf32> -> vector<128x8xf32>
    %c0_3 = arith.constant 0 : index
    %c0_4 = arith.constant 0 : index
    %3 = vector.load %arg2[%c0_3, %c0_4] : memref<2x8xf32, #tpu.memory_space<vmem>>, vector<1x8xf32>
    %4 = vector.broadcast %3 : vector<1x8xf32> to vector<128x8xf32>
    %5 = arith.addf %2, %4 : vector<128x8xf32>
    %cst_5 = arith.constant 0.000000e+00 : f32
    %6 = vector.broadcast %cst_5 : f32 to vector<128x8xf32>
    %7 = arith.cmpf ogt, %5, %6 : vector<128x8xf32>
    %c1 = arith.constant 1 : index
    %c0_6 = arith.constant 0 : index
    %8 = vector.load %arg2[%c1, %c0_6] : memref<2x8xf32, #tpu.memory_space<vmem>>, vector<1x8xf32>
    %9 = vector.broadcast %8 : vector<1x8xf32> to vector<128x8xf32>
    %10 = arith.mulf %9, %5 : vector<128x8xf32>
    %11 = arith.select %7, %5, %10 : vector<128x8xi1>, vector<128x8xf32>
    %c0_7 = arith.constant 0 : index
    %c0_8 = arith.constant 0 : index
    %12 = vector.load %arg3[%c0_7, %c0_8] : memref<128x256xf32, #tpu.memory_space<vmem>>, vector<128x256xf32>
    %13 = vector.extract_strided_slice %11 {offsets = [0, 0], sizes = [128, 1], strides = [1, 1]} : vector<128x8xf32> to vector<128x1xf32>
    %14 = vector.extract_strided_slice %12 {offsets = [0, 0], sizes = [128, 32], strides = [1, 1]} : vector<128x256xf32> to vector<128x32xf32>
    %15 = vector.broadcast %13 : vector<128x1xf32> to vector<128x32xf32>
    %16 = arith.mulf %15, %14 : vector<128x32xf32>
    %17 = vector.extract_strided_slice %11 {offsets = [0, 1], sizes = [128, 1], strides = [1, 1]} : vector<128x8xf32> to vector<128x1xf32>
    %18 = vector.extract_strided_slice %12 {offsets = [0, 32], sizes = [128, 32], strides = [1, 1]} : vector<128x256xf32> to vector<128x32xf32>
    %19 = vector.broadcast %17 : vector<128x1xf32> to vector<128x32xf32>
    %20 = arith.mulf %19, %18 : vector<128x32xf32>
    %21 = arith.addf %16, %20 : vector<128x32xf32>
    %22 = vector.extract_strided_slice %11 {offsets = [0, 2], sizes = [128, 1], strides = [1, 1]} : vector<128x8xf32> to vector<128x1xf32>
    %23 = vector.extract_strided_slice %12 {offsets = [0, 64], sizes = [128, 32], strides = [1, 1]} : vector<128x256xf32> to vector<128x32xf32>
    %24 = vector.broadcast %22 : vector<128x1xf32> to vector<128x32xf32>
    %25 = arith.mulf %24, %23 : vector<128x32xf32>
    %26 = arith.addf %21, %25 : vector<128x32xf32>
    %27 = vector.extract_strided_slice %11 {offsets = [0, 3], sizes = [128, 1], strides = [1, 1]} : vector<128x8xf32> to vector<128x1xf32>
    %28 = vector.extract_strided_slice %12 {offsets = [0, 96], sizes = [128, 32], strides = [1, 1]} : vector<128x256xf32> to vector<128x32xf32>
    %29 = vector.broadcast %27 : vector<128x1xf32> to vector<128x32xf32>
    %30 = arith.mulf %29, %28 : vector<128x32xf32>
    %31 = arith.addf %26, %30 : vector<128x32xf32>
    %32 = vector.extract_strided_slice %11 {offsets = [0, 4], sizes = [128, 1], strides = [1, 1]} : vector<128x8xf32> to vector<128x1xf32>
    %33 = vector.extract_strided_slice %12 {offsets = [0, 128], sizes = [128, 32], strides = [1, 1]} : vector<128x256xf32> to vector<128x32xf32>
    %34 = vector.broadcast %32 : vector<128x1xf32> to vector<128x32xf32>
    %35 = arith.mulf %34, %33 : vector<128x32xf32>
    %36 = arith.addf %31, %35 : vector<128x32xf32>
    %37 = vector.extract_strided_slice %11 {offsets = [0, 5], sizes = [128, 1], strides = [1, 1]} : vector<128x8xf32> to vector<128x1xf32>
    %38 = vector.extract_strided_slice %12 {offsets = [0, 160], sizes = [128, 32], strides = [1, 1]} : vector<128x256xf32> to vector<128x32xf32>
    %39 = vector.broadcast %37 : vector<128x1xf32> to vector<128x32xf32>
    %40 = arith.mulf %39, %38 : vector<128x32xf32>
    %41 = arith.addf %36, %40 : vector<128x32xf32>
    %42 = vector.extract_strided_slice %11 {offsets = [0, 6], sizes = [128, 1], strides = [1, 1]} : vector<128x8xf32> to vector<128x1xf32>
    %43 = vector.extract_strided_slice %12 {offsets = [0, 192], sizes = [128, 32], strides = [1, 1]} : vector<128x256xf32> to vector<128x32xf32>
    %44 = vector.broadcast %42 : vector<128x1xf32> to vector<128x32xf32>
    %45 = arith.mulf %44, %43 : vector<128x32xf32>
    %46 = arith.addf %41, %45 : vector<128x32xf32>
    %47 = vector.extract_strided_slice %11 {offsets = [0, 7], sizes = [128, 1], strides = [1, 1]} : vector<128x8xf32> to vector<128x1xf32>
    %48 = vector.extract_strided_slice %12 {offsets = [0, 224], sizes = [128, 32], strides = [1, 1]} : vector<128x256xf32> to vector<128x32xf32>
    %49 = vector.broadcast %47 : vector<128x1xf32> to vector<128x32xf32>
    %50 = arith.mulf %49, %48 : vector<128x32xf32>
    %51 = arith.addf %46, %50 : vector<128x32xf32>
    %52 = tpu.iota {dimensions = array<i32: 1>} : vector<2x128xi32>
    %53 = tpu.iota {dimensions = array<i32: 0>} : vector<2x128xi32>
    %c64_i32 = arith.constant 64 : i32
    %54 = vector.broadcast %c64_i32 : i32 to vector<2x128xi32>
    %55 = arith.muli %53, %54 : vector<2x128xi32>
    %56 = arith.cmpi sge, %52, %55 : vector<2x128xi32>
    %c1_i32 = arith.constant 1 : i32
    %57 = vector.broadcast %c1_i32 : i32 to vector<2x128xi32>
    %58 = arith.addi %53, %57 : vector<2x128xi32>
    %c64_i32_9 = arith.constant 64 : i32
    %59 = vector.broadcast %c64_i32_9 : i32 to vector<2x128xi32>
    %60 = arith.muli %58, %59 : vector<2x128xi32>
    %61 = arith.cmpi slt, %52, %60 : vector<2x128xi32>
    %62 = arith.andi %56, %61 : vector<2x128xi1>
    %cst_10 = arith.constant 1.000000e+00 : f32
    %cst_11 = arith.constant 0.000000e+00 : f32
    %63 = vector.broadcast %cst_10 : f32 to vector<2x128xf32>
    %64 = vector.broadcast %cst_11 : f32 to vector<2x128xf32>
    %65 = arith.select %62, %63, %64 : vector<2x128xi1>, vector<2x128xf32>
    %cst_12 = arith.constant dense<0.000000e+00> : vector<2x32xf32>
    %66 = tpu.matmul %65, %51, %cst_12 {dimension_numbers = #tpu.dot_dimension_numbers<[1], [0], [0], [1], [0, 0, 1, 1], [], []>} : vector<2x128xf32>, vector<128x32xf32>, vector<2x32xf32> -> vector<2x32xf32>
    %c0_13 = arith.constant 0 : index
    %c0_14 = arith.constant 0 : index
    %67 = vector.load %arg5[%c0_13, %c0_14] : memref<3x32xf32, #tpu.memory_space<vmem>>, vector<1x32xf32>
    %68 = vector.broadcast %67 : vector<1x32xf32> to vector<2x32xf32>
    %69 = arith.addf %66, %68 : vector<2x32xf32>
    %cst_15 = arith.constant 0.000000e+00 : f32
    %70 = vector.broadcast %cst_15 : f32 to vector<2x32xf32>
    %71 = arith.cmpf ogt, %69, %70 : vector<2x32xf32>
    %c1_16 = arith.constant 1 : index
    %c0_17 = arith.constant 0 : index
    %72 = vector.load %arg5[%c1_16, %c0_17] : memref<3x32xf32, #tpu.memory_space<vmem>>, vector<1x32xf32>
    %73 = vector.broadcast %72 : vector<1x32xf32> to vector<2x32xf32>
    %74 = arith.mulf %73, %69 : vector<2x32xf32>
    %75 = arith.select %71, %69, %74 : vector<2x32xi1>, vector<2x32xf32>
    %c0_18 = arith.constant 0 : index
    %c0_19 = arith.constant 0 : index
    %76 = vector.load %arg4[%c0_18, %c0_19] : memref<32x8xf32, #tpu.memory_space<vmem>>, vector<32x8xf32>
    %cst_20 = arith.constant dense<0.000000e+00> : vector<2x8xf32>
    %77 = tpu.matmul %75, %76, %cst_20 {dimension_numbers = #tpu.dot_dimension_numbers<[1], [0], [0], [1], [0, 0, 1, 1], [], []>} : vector<2x32xf32>, vector<32x8xf32>, vector<2x8xf32> -> vector<2x8xf32>
    %c2 = arith.constant 2 : index
    %c0_21 = arith.constant 0 : index
    %78 = vector.load %arg5[%c2, %c0_21] : memref<3x32xf32, #tpu.memory_space<vmem>>, vector<1x8xf32>
    %79 = vector.broadcast %78 : vector<1x8xf32> to vector<2x8xf32>
    %80 = arith.addf %77, %79 : vector<2x8xf32>
    %81 = vector.extract_strided_slice %80 {offsets = [0, 0], sizes = [2, 5], strides = [1, 1]} : vector<2x8xf32> to vector<2x5xf32>
    %cst_22 = arith.constant dense<0xFF800000> : vector<2xf32>
    %82 = vector.multi_reduction <maximumf>, %81, %cst_22 [1] : vector<2x5xf32> to vector<2xf32>
    %83 = vector.shape_cast %82 : vector<2xf32> to vector<2x1xf32>
    %84 = vector.broadcast %83 : vector<2x1xf32> to vector<2x5xf32>
    %85 = arith.subf %81, %84 : vector<2x5xf32>
    %86 = math.exp %85 : vector<2x5xf32>
    %cst_23 = arith.constant dense<0.000000e+00> : vector<2xf32>
    %87 = vector.multi_reduction <add>, %86, %cst_23 [1] : vector<2x5xf32> to vector<2xf32>
    %88 = vector.shape_cast %87 : vector<2xf32> to vector<2x1xf32>
    %89 = math.log %88 : vector<2x1xf32>
    %90 = vector.broadcast %89 : vector<2x1xf32> to vector<2x5xf32>
    %91 = arith.subf %85, %90 : vector<2x5xf32>
    %c0_24 = arith.constant 0 : index
    %c0_25 = arith.constant 0 : index
    %92 = vector.load %arg6[%c0_24, %c0_25] : memref<2x5xf32, #tpu.memory_space<vmem>>, vector<2x5xf32>
    tpu.vector_store %arg6[%c0_24, %c0_25], %91 {strides = array<i32>} : memref<2x5xf32, #tpu.memory_space<vmem>>, vector<2x5xf32>,
    %93 = vector.extract_strided_slice %80 {offsets = [0, 5], sizes = [2, 3], strides = [1, 1]} : vector<2x8xf32> to vector<2x3xf32>
    %cst_26 = arith.constant dense<0xFF800000> : vector<2xf32>
    %94 = vector.multi_reduction <maximumf>, %93, %cst_26 [1] : vector<2x3xf32> to vector<2xf32>
    %95 = vector.shape_cast %94 : vector<2xf32> to vector<2x1xf32>
    %96 = vector.broadcast %95 : vector<2x1xf32> to vector<2x3xf32>
    %97 = arith.subf %93, %96 : vector<2x3xf32>
    %98 = math.exp %97 : vector<2x3xf32>
    %cst_27 = arith.constant dense<0.000000e+00> : vector<2xf32>
    %99 = vector.multi_reduction <add>, %98, %cst_27 [1] : vector<2x3xf32> to vector<2xf32>
    %100 = vector.shape_cast %99 : vector<2xf32> to vector<2x1xf32>
    %101 = math.log %100 : vector<2x1xf32>
    %102 = vector.broadcast %101 : vector<2x1xf32> to vector<2x3xf32>
    %103 = arith.subf %97, %102 : vector<2x3xf32>
    %c0_28 = arith.constant 0 : index
    %c0_29 = arith.constant 0 : index
    %104 = vector.load %arg7[%c0_28, %c0_29] : memref<2x3xf32, #tpu.memory_space<vmem>>, vector<2x3xf32>
    tpu.vector_store %arg7[%c0_28, %c0_29], %103 {strides = array<i32>} : memref<2x3xf32, #tpu.memory_space<vmem>>, vector<2x3xf32>,
    return
  }
}

</mosaic_0001>

<bundles_post_ra>
// kernel: stage1_forward.1
= control target key start
LH: loop header
LB: loop body
LE: loop exit
PB: predicated region body
PF: predicated region fallthrough
CT: control target
= control target key end

     0   :  { %13 = vsyncpa [#allocation3], 0  ;;  %v3499_v3 = vmov 0.0|0.0   ;;  %vm82_vm0 = vcmask 130048   ;;  %s3491_s0 = inlined_call_operand.vmem [shape: f32[128,144], index: 0, kind: input, shape index: {}]   ;;  %s3492_s1 = inlined_call_operand.vmem [shape: f32[144,8], index: 1, kind: input, shape index: {}]   ;;  %s3493_s2 = inlined_call_operand.vmem [shape: f32[2,8], index: 2, kind: input, shape index: {}]   ;;  %s3494_s3 = inlined_call_operand.vmem [shape: f32[128,256], index: 3, kind: input, shape index: {}]   ;;  %s3495_s4 = inlined_call_operand.vmem [shape: f32[32,8], index: 4, kind: input, shape index: {}]   ;;  %s3496_s5 = inlined_call_operand.vmem [shape: f32[3,32], index: 5, kind: input, shape index: {}]   ;;  %s3497_s6 = inlined_call_operand.hbm [shape: f32[2,5], index: 6, kind: output, shape index: {0}]   ;;  %s3498_s7 = inlined_call_operand.hbm [shape: f32[2,3], index: 7, kind: output, shape index: {1}]  }
   0x1   :  { %v59_v0 = vld [vmem:[%s3492_s1] sm:$0xff]  ;;  %v60_v1 = vld [vmem:[%s3492_s1 + $0x8] sm:$0xff]  ;;  %v61_v2 = vld [vmem:[%s3492_s1 + $0x10] sm:$0xff]  ;;  %1846 = vmatprep.subr.bf16.mxu0 %v3499_v3  ;;  %1873 = vmatprep.subr.bf16.mxu1 %v3499_v3 }
   0x2   :  { %v1847_v4 = vpack.c.bf16 %v60_v1, %v59_v0  ;;  %v62_v5 = vld [vmem:[%s3492_s1 + $0x18] sm:$0xff]  ;;  %v63_v7 = vld [vmem:[%s3492_s1 + $0x20] sm:$0xff]  ;;  %v64_v8 = vld [vmem:[%s3492_s1 + $0x28] sm:$0xff] }
   0x3   :  { %v1850_v6 = vpack.c.bf16 %v62_v5, %v61_v2  ;;  %v28_v9 = vld [vmem:[%s3491_s0 + $0x8] sm:$0xff]  ;;  %v1853_v10 = vpack.c.bf16 %v64_v8, %v63_v7  ;;  %v65_v11 = vld [vmem:[%s3492_s1 + $0x30] sm:$0xff]  ;;  %v66_v12 = vld [vmem:[%s3492_s1 + $0x38] sm:$0xff] }
   0x4   :  { %1848 = vmatpush1.bf16.msra.mxu0 %v1847_v4  ;;  %1756 = vmatprep.mubr.msk.f32.mxu0 %vm82_vm0, %v28_v9  ;;  %v1856_v13 = vpack.c.bf16 %v66_v12, %v65_v11  ;;  %v67_v14 = vld [vmem:[%s3492_s1 + $0x40] sm:$0xff]  ;;  %v68_v15 = vld [vmem:[%s3492_s1 + $0x48] sm:$0xff]  ;;  %v69_v17 = vld [vmem:[%s3492_s1 + $0x50] sm:$0xff] }
   0x5   :  { %1849 = vmatprep.subr.bf16.mxu0 %v3499_v3  ;;  %v1859_v16 = vpack.c.bf16 %v68_v15, %v67_v14  ;;  %v70_v18 = vld [vmem:[%s3492_s1 + $0x58] sm:$0xff] }
   0x8   :  { %1851 = vmatpush1.bf16.msra.mxu0 %v1850_v6 }
   0x9   :  { %1852 = vmatprep.subr.bf16.mxu0 %v3499_v3 }
   0xc   :  { %1854 = vmatpush1.bf16.msra.mxu0 %v1853_v10 }
   0xd   :  { %1855 = vmatprep.subr.bf16.mxu0 %v3499_v3 }
  0x10   :  { %1857 = vmatpush1.bf16.msra.mxu0 %v1856_v13 }
  0x11   :  { %1858 = vmatprep.subr.bf16.mxu0 %v3499_v3 }
  0x12   :  { %14 = vsyncpa [#allocation5], 0  ;;  %v1862_v19 = vpack.c.bf16 %v70_v18, %v69_v17  ;;  %v71_v20 = vld [vmem:[%s3492_s1 + $0x60] sm:$0xff]  ;;  %v72_v21 = vld [vmem:[%s3492_s1 + $0x68] sm:$0xff]  ;;  %v3504_v60 = vmov 2   ;;  %v3506_v61 = vmov 1  }
  0x13   :  { %v1865_v22 = vpack.c.bf16 %v72_v21, %v71_v20  ;;  %v73_v23 = vld [vmem:[%s3492_s1 + $0x70] sm:$0xff]  ;;  %v74_v24 = vld [vmem:[%s3492_s1 + $0x78] sm:$0xff]  ;;  %v75_v26 = vld [vmem:[%s3492_s1 + $0x80] sm:$0xff]  ;;  %1922 = vset.pattern.permute.xlu1 %v3504_v60  ;;  %1921 = vset.pattern.permute.xlu0 %v3506_v61  ;;  %v3510_v10 = vmov 5   ;;  %v3502_v11 = vmov 3   ;;  %v3512_v14 = vmov 7  }
  0x14   :  { %1860 = vmatpush1.bf16.msra.mxu0 %v1859_v16  ;;  %v1868_v25 = vpack.c.bf16 %v74_v24, %v73_v23  ;;  %v76_v27 = vld [vmem:[%s3492_s1 + $0x88] sm:$0xff]  ;;  %v27_v29 = vld [vmem:[%s3491_s0] sm:$0xff]  ;;  %v30_v30 = vld [vmem:[%s3491_s0 + $0x18] sm:$0xff]  ;;  %v3508_v15 = vmov 6   ;;  %v3514_v20 = vmov 0   ;;  %s2109_s10 = smov 96  }
  0x15   :  { %1861 = vmatprep.subr.bf16.mxu0 %v3499_v3  ;;  %v1871_v28 = vpack.c.bf16 %v76_v27, %v75_v26  ;;  %v29_v31 = vld [vmem:[%s3491_s0 + $0x10] sm:$0xff]  ;;  %v32_v32 = vld [vmem:[%s3491_s0 + $0x28] sm:$0xff]  ;;  %v31_v33 = vld [vmem:[%s3491_s0 + $0x20] sm:$0xff]  ;;  %s2110_s11 = smov 64   ;;  %s2111_s18 = smov 32  }
  0x16   :  { %v34_v34 = vld [vmem:[%s3491_s0 + $0x38] sm:$0xff]  ;;  %v33_v35 = vld [vmem:[%s3491_s0 + $0x30] sm:$0xff]  ;;  %v36_v36 = vld [vmem:[%s3491_s0 + $0x48] sm:$0xff]  ;;  %s2115_s14 = smov 123  }
  0x17   :  { %v35_v37 = vld [vmem:[%s3491_s0 + $0x40] sm:$0xff]  ;;  %v38_v38 = vld [vmem:[%s3491_s0 + $0x58] sm:$0xff]  ;;  %v37_v39 = vld [vmem:[%s3491_s0 + $0x50] sm:$0xff] }
  0x18   :  { %1863 = vmatpush1.bf16.msra.mxu0 %v1862_v19  ;;  %v40_v40 = vld [vmem:[%s3491_s0 + $0x68] sm:$0xff]  ;;  %v39_v41 = vld [vmem:[%s3491_s0 + $0x60] sm:$0xff]  ;;  %v42_v42 = vld [vmem:[%s3491_s0 + $0x78] sm:$0xff]  ;;  %v3501_v19 = vmov 4  }
  0x19   :  { %1864 = vmatprep.subr.bf16.mxu0 %v3499_v3  ;;  %v41_v43 = vld [vmem:[%s3491_s0 + $0x70] sm:$0xff]  ;;  %v44_v44 = vld [vmem:[%s3491_s0 + $0x88] sm:$0xff]  ;;  %v43_v45 = vld [vmem:[%s3491_s0 + $0x80] sm:$0xff] }
  0x1a   :  { %v46_v46 = vld [vmem:[%s3491_s0 + $0x98] sm:$0xff]  ;;  %v45_v47 = vld [vmem:[%s3491_s0 + $0x90] sm:$0xff]  ;;  %v48_v48 = vld [vmem:[%s3491_s0 + $0xa8] sm:$0xff] }
  0x1b   :  { %v47_v49 = vld [vmem:[%s3491_s0 + $0xa0] sm:$0xff]  ;;  %v50_v50 = vld [vmem:[%s3491_s0 + $0xb8] sm:$0xff]  ;;  %v49_v51 = vld [vmem:[%s3491_s0 + $0xb0] sm:$0xff] }
  0x1c   :  { %1866 = vmatpush1.bf16.msra.mxu0 %v1865_v22  ;;  %v52_v52 = vld [vmem:[%s3491_s0 + $0xc8] sm:$0xff]  ;;  %v51_v53 = vld [vmem:[%s3491_s0 + $0xc0] sm:$0xff]  ;;  %v54_v54 = vld [vmem:[%s3491_s0 + $0xd8] sm:$0xff] }
  0x1d   :  { %1867 = vmatprep.subr.bf16.mxu0 %v3499_v3  ;;  %v53_v55 = vld [vmem:[%s3491_s0 + $0xd0] sm:$0xff]  ;;  %v56_v56 = vld [vmem:[%s3491_s0 + $0xe8] sm:$0xff]  ;;  %v55_v57 = vld [vmem:[%s3491_s0 + $0xe0] sm:$0xff] }
  0x1e   :  { %v58_v58 = vld [vmem:[%s3491_s0 + $0xf8] sm:$0xff]  ;;  %v57_v59 = vld [vmem:[%s3491_s0 + $0xf0] sm:$0xff]  ;;  %v2339_v62 = vld [vmem:[%s3493_s2] ss:$0 sm:$0xff] }
  0x1f   :  { %v2344_v0 = vld [vmem:[%s3493_s2 + $0x1] ss:$0 sm:$0xff] }
  0x20   :  { %1869 = vmatpush1.bf16.msra.mxu0 %v1868_v25 }
  0x21   :  { %1870 = vmatprep.subr.bf16.mxu0 %v3499_v3 }
  0x24   :  { %1872 = vmatpush1.bf16.msra.mxu0 %v1871_v28 }
  0x27   :  { %196 = vmatmul.mubr.f32.vlgmr.msra.gmra.mrb[0].mxu0 %v27_v29 }
  0x28   :  { %1757 = vmatprep.mubr.msk.f32.mxu0 %vm82_vm0, %v30_v30 }
  0x2b   :  { %201 = vmatmul.mubr.f32.gmra.mrb[2].mxu0 %v29_v31 }
  0x2c   :  { %1758 = vmatprep.mubr.msk.f32.mxu0 %vm82_vm0, %v32_v32 }
  0x2f   :  { %206 = vmatmul.mubr.f32.gmra.mrb[4].mxu0 %v31_v33 }
  0x30   :  { %1759 = vmatprep.mubr.msk.f32.mxu0 %vm82_vm0, %v34_v34 }
  0x33   :  { %211 = vmatmul.mubr.f32.gmra.mrb[6].mxu0 %v33_v35 }
  0x34   :  { %1760 = vmatprep.mubr.msk.f32.mxu0 %vm82_vm0, %v36_v36 }
  0x37   :  { %216 = vmatmul.mubr.f32.gmra.mrb[8].mxu0 %v35_v37 }
  0x38   :  { %1761 = vmatprep.mubr.msk.f32.mxu0 %vm82_vm0, %v38_v38 }
  0x3b   :  { %221 = vmatmul.mubr.f32.gmra.mrb[10].mxu0 %v37_v39 }
  0x3c   :  { %1762 = vmatprep.mubr.msk.f32.mxu0 %vm82_vm0, %v40_v40 }
  0x3f   :  { %226 = vmatmul.mubr.f32.gmra.mrb[12].mxu0 %v39_v41 }
  0x40   :  { %1763 = vmatprep.mubr.msk.f32.mxu0 %vm82_vm0, %v42_v42 }
  0x43   :  { %231 = vmatmul.mubr.f32.gmra.mrb[14].mxu0 %v41_v43 }
  0x44   :  { %1764 = vmatprep.mubr.msk.f32.mxu0 %vm82_vm0, %v44_v44 }
  0x47   :  { %236 = vmatmul.mubr.f32.gmra.mrb[16].mxu0 %v43_v45 }
  0x48   :  { %1765 = vmatprep.mubr.msk.f32.mxu0 %vm82_vm0, %v46_v46 }
  0x4b   :  { %241 = vmatmul.mubr.f32.gmra.mrb[18].mxu0 %v45_v47 }
  0x4c   :  { %1766 = vmatprep.mubr.msk.f32.mxu0 %vm82_vm0, %v48_v48 }
  0x4f   :  { %246 = vmatmul.mubr.f32.gmra.mrb[20].mxu0 %v47_v49 }
  0x50   :  { %1767 = vmatprep.mubr.msk.f32.mxu0 %vm82_vm0, %v50_v50 }
  0x53   :  { %251 = vmatmul.mubr.f32.gmra.mrb[22].mxu0 %v49_v51 }
  0x54   :  { %1768 = vmatprep.mubr.msk.f32.mxu0 %vm82_vm0, %v52_v52 }
  0x57   :  { %256 = vmatmul.mubr.f32.gmra.mrb[24].mxu0 %v51_v53 }
  0x58   :  { %1769 = vmatprep.mubr.msk.f32.mxu0 %vm82_vm0, %v54_v54 }
  0x5b   :  { %261 = vmatmul.mubr.f32.gmra.mrb[26].mxu0 %v53_v55 }
  0x5c   :  { %1770 = vmatprep.mubr.msk.f32.mxu0 %vm82_vm0, %v56_v56 }
  0x5f   :  { %266 = vmatmul.mubr.f32.gmra.mrb[28].mxu0 %v55_v57 }
  0x60   :  { %1771 = vmatprep.mubr.msk.f32.mxu0 %vm82_vm0, %v58_v58 }
  0x63   :  { %271 = vmatmul.mubr.f32.gmra.mrb[30].mxu0 %v57_v59 }
  0xfa   :  { %v197_v63 = vpop.f32.mrb[0].mxu0 }
  0xfb   :  { %v198_v1 = vadd.f32 %v2339_v62, %v197_v63  ;;  %v199_v2 = vpop.f32.mrb[1].mxu0 }
  0xfd   :  { %vm276_vm1 = vcmp.gt.f32.partialorder %v198_v1, 0.0  ;;  %v297_v4 = vmul.f32 %v2344_v0, %v198_v1 }
  0xfe   :  { %v202_v5 = vpop.f32.mrb[2].mxu0 }
  0xff   :  { %v313_v6 = vsel %vm276_vm1, %v198_v1, %v297_v4  ;;  %v204_v7 = vpop.f32.mrb[3].mxu0  ;;  %v203_v17 = vadd.f32 %v2339_v62, %v202_v5  ;;  %vm2112_vm1 = vmmov 0  }
 0x100   :  { %618 = vperm.xlu1 %1922, %v313_v6   ;;  %458 = vperm.xlu0 %1921, %v313_v6  }
 0x101   :  { %v298_v22 = vmul.f32 %v2344_v0, %v203_v17  ;;  %vm277_vm2 = vcmp.gt.f32.partialorder %v203_v17, 0.0 }
 0x102   :  { %v207_v8 = vpop.f32.mrb[4].mxu0 }
 0x103   :  { %v209_v9 = vpop.f32.mrb[5].mxu0  ;;  %v314_v25 = vsel %vm277_vm2, %v203_v17, %v298_v22  ;;  %v208_v32 = vadd.f32 %v2339_v62, %v207_v8 }
 0x104   :  { %1924 = vset.pattern.permute.xlu1 %v3510_v10  ;;  %1923 = vset.pattern.permute.xlu0 %v3502_v11 }
 0x105   :  { %1034 = vperm.xlu1 %1924, %v313_v6   ;;  %778 = vperm.xlu0 %1923, %v313_v6   ;;  %v299_v35 = vmul.f32 %v2344_v0, %v208_v32  ;;  %vm278_vm3 = vcmp.gt.f32.partialorder %v208_v32, 0.0 }
 0x106   :  { %v2350_v12 = vpop.f32.mrb[6].mxu0 }
 0x107   :  { %v214_v13 = vpop.f32.mrb[7].mxu0  ;;  %v315_v38 = vsel %vm278_vm3, %v208_v32, %v299_v35  ;;  %v213_v42 = vadd.f32 %v2339_v62, %v2350_v12 }
 0x109   :  { %1926 = vset.pattern.permute.xlu1 %v3512_v14  ;;  %1925 = vset.pattern.permute.xlu0 %v3508_v15  ;;  %v300_v45 = vmul.f32 %v2344_v0, %v213_v42  ;;  %vm279_vm4 = vcmp.gt.f32.partialorder %v213_v42, 0.0 }
 0x10a   :  { %1354 = vperm.xlu1 %1926, %v313_v6   ;;  %1194 = vperm.xlu0 %1925, %v313_v6   ;;  %v2354_v16 = vpop.f32.mrb[8].mxu0 }
 0x10b   :  { %v219_v18 = vpop.f32.mrb[9].mxu0  ;;  %v316_v46 = vsel %vm279_vm4, %v213_v42, %v300_v45  ;;  %v218_v51 = vadd.f32 %v2339_v62, %v2354_v16 }
 0x10d   :  { %v301_v52 = vmul.f32 %v2344_v0, %v218_v51  ;;  %vm280_vm5 = vcmp.gt.f32.partialorder %v218_v51, 0.0 }
 0x10e   :  { %1928 = vset.pattern.permute.xlu1 %v3501_v19  ;;  %1927 = vset.pattern.permute.xlu0 %v3514_v20  ;;  %v2359_v21 = vpop.f32.mrb[10].mxu0 }
 0x10f   :  { %938 = vperm.xlu1 %1928, %v313_v6   ;;  %363 = vperm.xlu0 %1927, %v313_v6   ;;  %v224_v23 = vpop.f32.mrb[11].mxu0  ;;  %v317_v53 = vsel %vm280_vm5, %v218_v51, %v301_v52  ;;  %v223_v54 = vadd.f32 %v2339_v62, %v2359_v21 }
 0x111   :  { %v302_v55 = vmul.f32 %v2344_v0, %v223_v54  ;;  %vm281_vm6 = vcmp.gt.f32.partialorder %v223_v54, 0.0 }
 0x112   :  { %v2362_v24 = vpop.f32.mrb[12].mxu0 }
 0x113   :  { %1930 = vset.pattern.permute.xlu1 %v3504_v60  ;;  %1929 = vset.pattern.permute.xlu0 %v3506_v61  ;;  %v229_v26 = vpop.f32.mrb[13].mxu0  ;;  %v228_v56 = vadd.f32 %v2339_v62, %v2362_v24  ;;  %v2423_v57 = vsel %vm281_vm6, %v223_v54, %v302_v55  ;;  %vm1616_vm6 = vcmask 261120  }
 0x114   :  { %622 = vperm.xlu1 %1930, %v314_v25   ;;  %462 = vperm.xlu0 %1929, %v314_v25  }
 0x115   :  { %v303_v58 = vmul.f32 %v2344_v0, %v228_v56  ;;  %vm282_vm7 = vcmp.gt.f32.partialorder %v228_v56, 0.0 }
 0x116   :  { %v2366_v27 = vpop.f32.mrb[14].mxu0 }
 0x117   :  { %v234_v28 = vpop.f32.mrb[15].mxu0  ;;  %v2429_v59 = vsel %vm282_vm7, %v228_v56, %v303_v58  ;;  %v233_v63 = vadd.f32 %v2339_v62, %v2366_v27  ;;  %vm1704_vm7 = vcmask 58408  }
 0x118   :  { %1931 = vset.pattern.permute.xlu1 %v3502_v11  ;;  %1932 = vset.pattern.permute.xlu0 %v3510_v10 }
 0x119   :  { %782 = vperm.xlu1 %1931, %v314_v25   ;;  %1038 = vperm.xlu0 %1932, %v314_v25   ;;  %v304_v1 = vmul.f32 %v2344_v0, %v233_v63  ;;  %vm283_vm8 = vcmp.gt.f32.partialorder %v233_v63, 0.0 }
 0x11a   :  { %v2370_v29 = vpop.f32.mrb[16].mxu0 }
 0x11b   :  { %v239_v30 = vpop.f32.mrb[17].mxu0  ;;  %v2443_v2 = vsel %vm283_vm8, %v233_v63, %v304_v1  ;;  %v238_v4 = vadd.f32 %v2339_v62, %v2370_v29  ;;  %vm1690_vm8 = vcmask 33792  }
 0x11d   :  { %1933 = vset.pattern.permute.xlu1 %v3508_v15  ;;  %1934 = vset.pattern.permute.xlu0 %v3512_v14  ;;  %v305_v5 = vmul.f32 %v2344_v0, %v238_v4  ;;  %vm284_vm9 = vcmp.gt.f32.partialorder %v238_v4, 0.0 }
 0x11e   :  { %1198 = vperm.xlu1 %1933, %v314_v25   ;;  %1358 = vperm.xlu0 %1934, %v314_v25   ;;  %v2374_v31 = vpop.f32.mrb[18].mxu0 }
 0x11f   :  { %v244_v33 = vpop.f32.mrb[19].mxu0  ;;  %v2456_v6 = vsel %vm284_vm9, %v238_v4, %v305_v5  ;;  %v243_v7 = vadd.f32 %v2339_v62, %v2374_v31  ;;  %vm1715_vm9 = vcmask 17408  }
 0x121   :  { %v306_v9 = vmul.f32 %v2344_v0, %v243_v7  ;;  %vm285_vm10 = vcmp.gt.f32.partialorder %v243_v7, 0.0 }
 0x122   :  { %1935 = vset.pattern.permute.xlu1 %v3514_v20  ;;  %1936 = vset.pattern.permute.xlu0 %v3501_v19  ;;  %v2379_v34 = vpop.f32.mrb[20].mxu0 }
 0x123   :  { %368 = vperm.xlu1 %1935, %v314_v25   ;;  %942 = vperm.xlu0 %1936, %v314_v25   ;;  %v249_v36 = vpop.f32.mrb[21].mxu0  ;;  %v2475_v12 = vsel %vm285_vm10, %v243_v7, %v306_v9  ;;  %v248_v16 = vadd.f32 %v2339_v62, %v2379_v34 }
 0x125   :  { %v307_v18 = vmul.f32 %v2344_v0, %v248_v16  ;;  %vm286_vm11 = vcmp.gt.f32.partialorder %v248_v16, 0.0 }
 0x126   :  { %v2382_v37 = vpop.f32.mrb[22].mxu0 }
 0x127   :  { %1938 = vset.pattern.permute.xlu1 %v3504_v60  ;;  %1937 = vset.pattern.permute.xlu0 %v3506_v61  ;;  %v254_v39 = vpop.f32.mrb[23].mxu0  ;;  %v2494_v22 = vsel %vm286_vm11, %v248_v16, %v307_v18  ;;  %v253_v28 = vadd.f32 %v2339_v62, %v2382_v37 }
 0x128   :  { %626 = vperm.xlu1 %1938, %v315_v38   ;;  %466 = vperm.xlu0 %1937, %v315_v38  }
 0x129   :  { %v308_v30 = vmul.f32 %v2344_v0, %v253_v28  ;;  %vm287_vm12 = vcmp.gt.f32.partialorder %v253_v28, 0.0 }
 0x12a   :  { %v2386_v40 = vpop.f32.mrb[24].mxu0 }
 0x12b   :  { %v259_v41 = vpop.f32.mrb[25].mxu0  ;;  %v258_v32 = vadd.f32 %v2339_v62, %v2386_v40  ;;  %v2531_v33 = vsel %vm287_vm12, %v253_v28, %v308_v30 }
 0x12c   :  { %1942 = vset.pattern.permute.xlu1 %v3512_v14  ;;  %1939 = vset.pattern.permute.xlu0 %v3502_v11 }
 0x12d   :  { %1362 = vperm.xlu1 %1942, %v315_v38   ;;  %786 = vperm.xlu0 %1939, %v315_v38   ;;  %v309_v35 = vmul.f32 %v2344_v0, %v258_v32  ;;  %vm288_vm13 = vcmp.gt.f32.partialorder %v258_v32, 0.0 }
 0x12e   :  { %v2392_v43 = vpop.f32.mrb[26].mxu0 }
 0x12f   :  { %v264_v44 = vpop.f32.mrb[27].mxu0  ;;  %v2542_v37 = vsel %vm288_vm13, %v258_v32, %v309_v35  ;;  %v263_v39 = vadd.f32 %v2339_v62, %v2392_v43 }
 0x130   :  { %3526 = vst [vmem:[#allocation11_spill] sm:$0xff] %v2542_v37 }
 0x131   :  { %1943 = vset.pattern.permute.xlu1 %v3514_v20  ;;  %1940 = vset.pattern.permute.xlu0 %v3510_v10  ;;  %v310_v42 = vmul.f32 %v2344_v0, %v263_v39  ;;  %vm289_vm14 = vcmp.gt.f32.partialorder %v263_v39, 0.0 }
 0x132   :  { %373 = vperm.xlu1 %1943, %v315_v38   ;;  %1042 = vperm.xlu0 %1940, %v315_v38   ;;  %v2399_v47 = vpop.f32.mrb[28].mxu0 }
 0x133   :  { %v269_v48 = vpop.f32.mrb[29].mxu0  ;;  %v2563_v44 = vsel %vm289_vm14, %v263_v39, %v310_v42 }
 0x136   :  { %1945 = vset.pattern.permute.xlu1 %v3506_v61  ;;  %1941 = vset.pattern.permute.xlu0 %v3508_v15  ;;  %v2403_v49 = vpop.f32.mrb[30].mxu0 }
 0x137   :  { %470 = vperm.xlu1 %1945, %v316_v46   ;;  %1202 = vperm.xlu0 %1941, %v315_v38   ;;  %v274_v50 = vpop.f32.mrb[31].mxu0  ;;  %v273_v52 = vadd.f32 %v2339_v62, %v2403_v49 }
 0x139   :  { %v312_v54 = vmul.f32 %v2344_v0, %v273_v52  ;;  %vm291_vm0 = vcmp.gt.f32.partialorder %v273_v52, 0.0 }
 0x13b   :  { %1947 = vset.pattern.permute.xlu1 %v3502_v11  ;;  %1944 = vset.pattern.permute.xlu0 %v3501_v19 }
 0x13c   :  { %790 = vperm.xlu1 %1947, %v316_v46   ;;  %946 = vperm.xlu0 %1944, %v315_v38  }
 0x140   :  { %1948 = vset.pattern.permute.xlu1 %v3510_v10  ;;  %1946 = vset.pattern.permute.xlu0 %v3504_v60 }
 0x141   :  { %1046 = vperm.xlu1 %1948, %v316_v46   ;;  %630 = vperm.xlu0 %1946, %v316_v46  }
 0x145   :  { %1949 = vset.pattern.permute.xlu1 %v3508_v15  ;;  %1950 = vset.pattern.permute.xlu0 %v3512_v14 }
 0x146   :  { %1206 = vperm.xlu1 %1949, %v316_v46   ;;  %1366 = vperm.xlu0 %1950, %v316_v46  }
 0x14a   :  { %1952 = vset.pattern.permute.xlu1 %v3501_v19  ;;  %1951 = vset.pattern.permute.xlu0 %v3514_v20 }
 0x14b   :  { %950 = vperm.xlu1 %1952, %v316_v46   ;;  %378 = vperm.xlu0 %1951, %v316_v46   ;;  %v268_v46 = vadd.f32 %v2339_v62, %v2399_v47  ;;  %v2595_v62 = vsel %vm291_vm0, %v273_v52, %v312_v54 }
 0x14d   :  { %v311_v51 = vmul.f32 %v2344_v0, %v268_v46  ;;  %vm290_vm15 = vcmp.gt.f32.partialorder %v268_v46, 0.0 }
 0x14f   :  { %1953 = vset.pattern.permute.xlu1 %v3506_v61  ;;  %1956 = vset.pattern.permute.xlu0 %v3510_v10  ;;  %v2584_v47 = vsel %vm290_vm15, %v268_v46, %v311_v51 }
 0x150   :  { %474 = vperm.xlu1 %1953, %v317_v53   ;;  %1050 = vperm.xlu0 %1956, %v317_v53  }
 0x154   :  { %1954 = vset.pattern.permute.xlu1 %v3504_v60  ;;  %1957 = vset.pattern.permute.xlu0 %v3508_v15 }
 0x155   :  { %634 = vperm.xlu1 %1954, %v317_v53   ;;  %1210 = vperm.xlu0 %1957, %v317_v53  }
 0x159   :  { %1955 = vset.pattern.permute.xlu1 %v3502_v11  ;;  %1966 = vset.pattern.permute.xlu0 %v3512_v14 }
 0x15a   :  { %794 = vperm.xlu1 %1955, %v317_v53   ;;  %1374 = vperm.xlu0 %1966, %v2423_v57  }
 0x15e   :  { %1958 = vset.pattern.permute.xlu1 %v3512_v14  ;;  %1971 = vset.pattern.permute.xlu0 %v3510_v10 }
 0x15f   :  { %1370 = vperm.xlu1 %1958, %v317_v53   ;;  %1058 = vperm.xlu0 %1971, %v2429_v59  }
 0x163   :  { %1959 = vset.pattern.permute.xlu1 %v3514_v20  ;;  %1972 = vset.pattern.permute.xlu0 %v3508_v15 }
 0x164   :  { %383 = vperm.xlu1 %1959, %v317_v53   ;;  %1218 = vperm.xlu0 %1972, %v2429_v59  }
 0x168   :  { %1960 = vset.pattern.permute.xlu1 %v3501_v19  ;;  %1974 = vset.pattern.permute.xlu0 %v3514_v20 }
 0x169   :  { %954 = vperm.xlu1 %1960, %v317_v53   ;;  %393 = vperm.xlu0 %1974, %v2429_v59  }
 0x16d   :  { %1961 = vset.pattern.permute.xlu1 %v3506_v61  ;;  %1976 = vset.pattern.permute.xlu0 %v3506_v61 }
 0x16e   :  { %478 = vperm.xlu1 %1961, %v2423_v57   ;;  %486 = vperm.xlu0 %1976, %v2443_v2  }
 0x172   :  { %1962 = vset.pattern.permute.xlu1 %v3504_v60  ;;  %1981 = vset.pattern.permute.xlu0 %v3512_v14 }
 0x173   :  { %638 = vperm.xlu1 %1962, %v2423_v57   ;;  %1382 = vperm.xlu0 %1981, %v2443_v2  }
 0x177   :  { %1963 = vset.pattern.permute.xlu1 %v3502_v11  ;;  %1986 = vset.pattern.permute.xlu0 %v3510_v10 }
 0x178   :  { %798 = vperm.xlu1 %1963, %v2423_v57   ;;  %1066 = vperm.xlu0 %1986, %v2456_v6  }
 0x17c   :  { %1964 = vset.pattern.permute.xlu1 %v3510_v10  ;;  %1987 = vset.pattern.permute.xlu0 %v3508_v15 }
 0x17d   :  { %1054 = vperm.xlu1 %1964, %v2423_v57   ;;  %1226 = vperm.xlu0 %1987, %v2456_v6  }
 0x17f   :  { %v2468_v8 = vpop.permute.xlu1 %618  ;;  %v2492_v21 = vpop.permute.xlu0 %458 }
 0x181   :  { %1965 = vset.pattern.permute.xlu1 %v3508_v15  ;;  %1989 = vset.pattern.permute.xlu0 %v3514_v20 }
 0x182   :  { %1214 = vperm.xlu1 %1965, %v2423_v57   ;;  %403 = vperm.xlu0 %1989, %v2456_v6  }
 0x184   :  { %v2477_v13 = vpop.permute.xlu1 %1034  ;;  %v2502_v24 = vpop.permute.xlu0 %778 }
 0x186   :  { %1967 = vset.pattern.permute.xlu1 %v3514_v20  ;;  %1991 = vset.pattern.permute.xlu0 %v3506_v61 }
 0x187   :  { %388 = vperm.xlu1 %1967, %v2423_v57   ;;  %494 = vperm.xlu0 %1991, %v2475_v12  }
 0x189   :  { %v2485_v17 = vpop.permute.xlu1 %1354  ;;  %v2512_v27 = vpop.permute.xlu0 %1194 }
 0x18b   :  { %1968 = vset.pattern.permute.xlu1 %v3506_v61  ;;  %1996 = vset.pattern.permute.xlu0 %v3512_v14 }
 0x18c   :  { %482 = vperm.xlu1 %1968, %v2429_v59   ;;  %1390 = vperm.xlu0 %1996, %v2475_v12  }
 0x18e   :  { %v2496_v23 = vpop.permute.xlu1 %938  ;;  %v2523_v31 = vpop.permute.xlu0 %363 }
 0x18f   :  { %3523 = vst [vmem:[#allocation8_spill] sm:$0xff] %v2496_v23  ;;  %3524 = vst [vmem:[#allocation9_spill] sm:$0xff] %v2523_v31 }
 0x190   :  { %1969 = vset.pattern.permute.xlu1 %v3504_v60  ;;  %2001 = vset.pattern.permute.xlu0 %v3510_v10 }
 0x191   :  { %642 = vperm.xlu1 %1969, %v2429_v59   ;;  %1074 = vperm.xlu0 %2001, %v2494_v22  }
 0x193   :  { %v2504_v25 = vpop.permute.xlu1 %622  ;;  %v2538_v36 = vpop.permute.xlu0 %462 }
 0x195   :  { %1970 = vset.pattern.permute.xlu1 %v3502_v11  ;;  %2002 = vset.pattern.permute.xlu0 %v3508_v15 }
 0x196   :  { %802 = vperm.xlu1 %1970, %v2429_v59   ;;  %1234 = vperm.xlu0 %2002, %v2494_v22  }
 0x198   :  { %v2510_v26 = vpop.permute.xlu1 %782  ;;  %v2552_v40 = vpop.permute.xlu0 %1038 }
 0x19a   :  { %1973 = vset.pattern.permute.xlu1 %v3512_v14  ;;  %2003 = vset.pattern.permute.xlu0 %v3512_v14 }
 0x19b   :  { %1378 = vperm.xlu1 %1973, %v2429_v59   ;;  %1394 = vperm.xlu0 %2003, %v2494_v22  }
 0x19d   :  { %v2520_v29 = vpop.permute.xlu1 %1198  ;;  %v2561_v43 = vpop.permute.xlu0 %1358 }
 0x19f   :  { %1975 = vset.pattern.permute.xlu1 %v3501_v19  ;;  %2004 = vset.pattern.permute.xlu0 %v3514_v20 }
 0x1a0   :  { %962 = vperm.xlu1 %1975, %v2429_v59   ;;  %413 = vperm.xlu0 %2004, %v2494_v22  }
 0x1a2   :  { %v2533_v34 = vpop.permute.xlu1 %368  ;;  %v2575_v50 = vpop.permute.xlu0 %942 }
 0x1a3   :  { %3525 = vst [vmem:[#allocation10_spill] sm:$0xff] %v2533_v34  ;;  %3528 = vst [vmem:[#allocation13_spill] sm:$0xff] %v2575_v50  ;;  %v3549_v50 = vmov 0  }
 0x1a4   :  { %1977 = vset.pattern.permute.xlu1 %v3504_v60  ;;  %2006 = vset.pattern.permute.xlu0 %v3506_v61 }
 0x1a5   :  { %646 = vperm.xlu1 %1977, %v2443_v2   ;;  %502 = vperm.xlu0 %2006, %v2531_v33  }
 0x1a7   :  { %v2544_v38 = vpop.permute.xlu1 %626  ;;  %v2589_v55 = vpop.permute.xlu0 %466 }
 0x1a9   :  { %1978 = vset.pattern.permute.xlu1 %v3502_v11  ;;  %2018 = vset.pattern.permute.xlu0 %v3512_v14 }
 0x1aa   :  { %806 = vperm.xlu1 %1978, %v2443_v2   ;;  %1402 = vperm.xlu0 %2018, %v2542_v37  }
 0x1ac   :  { %v2554_v41 = vpop.permute.xlu1 %1362  ;;  %v2601_v0 = vpop.permute.xlu0 %786 }
 0x1ae   :  { %1979 = vset.pattern.permute.xlu1 %v3510_v10  ;;  %2019 = vset.pattern.permute.xlu0 %v3514_v20 }
 0x1af   :  { %1062 = vperm.xlu1 %1979, %v2443_v2   ;;  %423 = vperm.xlu0 %2019, %v2542_v37  }
 0x1b1   :  { %v2565_v45 = vpop.permute.xlu1 %373  ;;  %v2611_v58 = vpop.permute.xlu0 %1042 }
 0x1b2   :  { %3527 = vst [vmem:[#allocation12_spill] sm:$0xff] %v2565_v45  ;;  %v3548_v45 = vmov 7  }
 0x1b3   :  { %1980 = vset.pattern.permute.xlu1 %v3508_v15  ;;  %2020 = vset.pattern.permute.xlu0 %v3506_v61 }
 0x1b4   :  { %1222 = vperm.xlu1 %1980, %v2443_v2   ;;  %510 = vperm.xlu0 %2020, %v2563_v44  }
 0x1b6   :  { %v2573_v48 = vpop.permute.xlu1 %470  ;;  %v1203_v63 = vpop.permute.xlu0 %1202 }
 0x1b8   :  { %1982 = vset.pattern.permute.xlu1 %v3514_v20  ;;  %2024 = vset.pattern.permute.xlu0 %v3508_v15 }
 0x1b9   :  { %398 = vperm.xlu1 %1982, %v2443_v2   ;;  %1246 = vperm.xlu0 %2024, %v2563_v44  }
 0x1bb   :  { %v2586_v53 = vpop.permute.xlu1 %790  ;;  %v2627_v5 = vpop.permute.xlu0 %946 }
 0x1bc   :  { %3530 = vst [vmem:[#allocation15_spill] sm:$0xff] %v2627_v5 }
 0x1bd   :  { %1983 = vset.pattern.permute.xlu1 %v3506_v61  ;;  %2033 = vset.pattern.permute.xlu0 %v3514_v20 }
 0x1be   :  { %490 = vperm.xlu1 %1983, %v2456_v6   ;;  %433 = vperm.xlu0 %2033, %v2584_v47  }
 0x1c0   :  { %v2597_v49 = vpop.permute.xlu1 %1046  ;;  %v2635_v9 = vpop.permute.xlu0 %630 }
 0x1c2   :  { %1984 = vset.pattern.permute.xlu1 %v3504_v60  ;;  %2034 = vset.pattern.permute.xlu0 %v3506_v61 }
 0x1c3   :  { %650 = vperm.xlu1 %1984, %v2456_v6   ;;  %518 = vperm.xlu0 %2034, %v2595_v62  }
 0x1c5   :  { %v2605_v56 = vpop.permute.xlu1 %1206  ;;  %v1367_v16 = vpop.permute.xlu0 %1366 }
 0x1c7   :  { %1985 = vset.pattern.permute.xlu1 %v3502_v11  ;;  %2036 = vset.pattern.permute.xlu0 %v3502_v11 }
 0x1c8   :  { %810 = vperm.xlu1 %1985, %v2456_v6   ;;  %838 = vperm.xlu0 %2036, %v2595_v62  }
 0x1ca   :  { %v2613_v59 = vpop.permute.xlu1 %950  ;;  %v2664_v30 = vpop.permute.xlu0 %378 }
 0x1cb   :  { %3529 = vst [vmem:[#allocation14_spill] sm:$0xff] %v2613_v59  ;;  %3533 = vst [vmem:[#allocation18_spill] sm:$0xff] %v2664_v30  ;;  %v3545_v30 = vmov 6  }
 0x1cc   :  { %1988 = vset.pattern.permute.xlu1 %v3512_v14  ;;  %2038 = vset.pattern.permute.xlu0 %v3508_v15 }
 0x1cd   :  { %1386 = vperm.xlu1 %1988, %v2456_v6   ;;  %1254 = vperm.xlu0 %2038, %v2595_v62  }
 0x1cf   :  { %v2619_v1 = vpop.permute.xlu1 %474  ;;  %v2685_v42 = vpop.permute.xlu0 %1050 }
 0x1d1   :  { %1990 = vset.pattern.permute.xlu1 %v3501_v19  ;;  %2039 = vset.pattern.permute.xlu0 %v3501_v19 }
 0x1d2   :  { %970 = vperm.xlu1 %1990, %v2456_v6   ;;  %958 = vperm.xlu0 %2039, %v2423_v57   ;;  %v2642_v57 = vld [vmem:[%s3494_s3] sm:$0xff] }
 0x1d3   :  { %v681_v28 = vmul.f32 %v2468_v8, %v2642_v57  ;;  %v2675_v8 = vld [vmem:[%s3494_s3 + $0x10] sm:$0xff] }
 0x1d4   :  { %v2625_v4 = vpop.permute.xlu1 %634  ;;  %v842_v39 = vmul.f32 %v2510_v26, %v2675_v8  ;;  %v1211_v26 = vpop.permute.xlu0 %1210 }
 0x1d6   :  { %1992 = vset.pattern.permute.xlu1 %v3504_v60  ;;  %966 = vperm.xlu0 %2039, %v2443_v2   ;;  %v521_v2 = vmul.f32 %v2492_v21, %v2642_v57  ;;  %v2662_v21 = vld [vmem:[%s3494_s3 + $0x8] sm:$0xff] }
 0x1d7   :  { %654 = vperm.xlu1 %1992, %v2475_v12   ;;  %v1257_v32 = vmul.f32 %v2512_v27, %v2662_v21  ;;  %v2683_v27 = vld [vmem:[%s3494_s3 + $0x18] sm:$0xff] }
 0x1d8   :  { %v1098_v51 = vmul.f32 %v2552_v40, %v2683_v27  ;;  %v1418_v52 = vmul.f32 %v2561_v43, %v2683_v27  ;;  %v2703_v40 = vld [vmem:[%s3494_s3 + $0x28] sm:$0xff]  ;;  %v2711_v43 = vld [vmem:[%s3494_s3 + $0x30] sm:$0xff] }
 0x1d9   :  { %v2632_v7 = vpop.permute.xlu1 %794  ;;  %v2705_v54 = vpop.permute.xlu0 %1374 }
 0x1da   :  { %974 = vperm.xlu0 %2039, %v2475_v12  }
 0x1db   :  { %1993 = vset.pattern.permute.xlu1 %v3502_v11 }
 0x1dc   :  { %814 = vperm.xlu1 %1993, %v2475_v12  }
 0x1de   :  { %v2644_v6 = vpop.permute.xlu1 %1370  ;;  %982 = vperm.xlu0 %2039, %v2531_v33  }
 0x1df   :  { %3531 = vst [vmem:[#allocation16_spill] sm:$0xff] %v2644_v6 }
 0x1e0   :  { %1994 = vset.pattern.permute.xlu1 %v3510_v10 }
 0x1e1   :  { %1070 = vperm.xlu1 %1994, %v2475_v12  }
 0x1e2   :  { %553 = vrot.lane.b32.xlu0 %v521_v2, %s2109_s10 }
 0x1e3   :  { %v2652_v18 = vpop.permute.xlu1 %383 }
 0x1e4   :  { %3532 = vst [vmem:[#allocation17_spill] sm:$0xff] %v2652_v18  ;;  %v3543_v18 = vmov 5  }
 0x1e5   :  { %1995 = vset.pattern.permute.xlu1 %v3508_v15 }
 0x1e6   :  { %1230 = vperm.xlu1 %1995, %v2475_v12   ;;  %713 = vrot.lane.b32.xlu0 %v681_v28, %s2110_s11  ;;  %v1259_v28 = vmul.f32 %v1203_v63, %v2703_v40  ;;  %v844_v63 = vmul.f32 %v2586_v53, %v2711_v43 }
 0x1e8   :  { %v2668_v35 = vpop.permute.xlu1 %954 }
 0x1e9   :  { %3534 = vst [vmem:[#allocation19_spill] sm:$0xff] %v2668_v35 }
 0x1ea   :  { %1997 = vset.pattern.permute.xlu1 %v3514_v20  ;;  %1289 = vrot.lane.b32.xlu0 %v1257_v32, %s2110_s11  ;;  %v2716_v32 = vpop.permute.xlu0 %1058 }
 0x1eb   :  { %408 = vperm.xlu1 %1997, %v2475_v12  }
 0x1ed   :  { %v479_v46 = vpop.permute.xlu1 %478 }
 0x1ee   :  { %875 = vrot.lane.b32.xlu0 %v842_v39, %s2111_s18  ;;  %v524_v39 = vmul.f32 %v2573_v48, %v2711_v43 }
 0x1ef   :  { %1998 = vset.pattern.permute.xlu1 %v3506_v61 }
 0x1f0   :  { %498 = vperm.xlu1 %1998, %v2494_v22  }
 0x1f2   :  { %v2692_v12 = vpop.permute.xlu1 %638  ;;  %1131 = vrot.lane.b32.xlu0 %v1098_v51, %s2109_s10 }
 0x1f4   :  { %1999 = vset.pattern.permute.xlu1 %v3504_v60 }
 0x1f5   :  { %658 = vperm.xlu1 %1999, %v2494_v22  }
 0x1f6   :  { %1451 = vrot.lane.b32.xlu0 %v1418_v52, %s2111_s18  ;;  %v2728_v52 = vld [vmem:[%s3494_s3 + $0x38] sm:$0xff] }
 0x1f7   :  { %v799_v2 = vpop.permute.xlu1 %798  ;;  %v1100_v48 = vmul.f32 %v2597_v49, %v2728_v52  ;;  %v2751_v49 = vld [vmem:[%s3494_s3 + $0x48] sm:$0xff] }
 0x1f9   :  { %2000 = vset.pattern.permute.xlu1 %v3502_v11 }
 0x1fa   :  { %818 = vperm.xlu1 %2000, %v2494_v22   ;;  %1293 = vrot.lane.b32.xlu0 %v1259_v28, %s2110_s11  ;;  %v2730_v28 = vpop.permute.xlu0 %1218 }
 0x1fc   :  { %v1055_v51 = vpop.permute.xlu1 %1054 }
 0x1fe   :  { %2005 = vset.pattern.permute.xlu1 %v3501_v19  ;;  %559 = vrot.lane.b32.xlu0 %v524_v39, %s2109_s10  ;;  %v2742_v53 = vpop.permute.xlu0 %393  ;;  %v1420_v39 = vmul.f32 %v1367_v16, %v2728_v52  ;;  %v1261_v19 = vmul.f32 %v1211_v26, %v2751_v49 }
 0x1ff   :  { %978 = vperm.xlu1 %2005, %v2494_v22   ;;  %3536 = vst [vmem:[#allocation21_spill] sm:$0xff] %v2742_v53 }
 0x201   :  { %v2732_v3 = vpop.permute.xlu1 %1214 }
 0x202   :  { %879 = vrot.lane.b32.xlu0 %v844_v63, %s2111_s18  ;;  %v487_v16 = vpop.permute.xlu0 %486 }
 0x203   :  { %2007 = vset.pattern.permute.xlu1 %v3504_v60 }
 0x204   :  { %662 = vperm.xlu1 %2007, %v2531_v33  }
 0x206   :  { %v2739_v22 = vpop.permute.xlu1 %388  ;;  %1135 = vrot.lane.b32.xlu0 %v1100_v48, %s2109_s10  ;;  %v2759_v48 = vld [vmem:[%s3494_s3 + $0x50] sm:$0xff]  ;;  %v2769_v26 = vpop.permute.xlu0 %1382 }
 0x207   :  { %3535 = vst [vmem:[#allocation20_spill] sm:$0xff] %v2739_v22  ;;  %3537 = vst [vmem:[#allocation22_spill] sm:$0xff] %v2769_v26  ;;  %v846_v60 = vmul.f32 %v799_v2, %v2759_v48  ;;  %v3541_v22 = vmov 2  }
 0x208   :  { %2008 = vset.pattern.permute.xlu1 %v3502_v11 }
 0x209   :  { %822 = vperm.xlu1 %2008, %v2531_v33  }
 0x20a   :  { %1455 = vrot.lane.b32.xlu0 %v1420_v39, %s2111_s18  ;;  %v526_v39 = vmul.f32 %v479_v46, %v2759_v48  ;;  %v2784_v46 = vld [vmem:[%s3494_s3 + $0x70] sm:$0xff]  ;;  %v2789_v2 = vpop.permute.xlu0 %1066 }
 0x20b   :  { %v2753_v63 = vpop.permute.xlu1 %482 }
 0x20d   :  { %2009 = vset.pattern.permute.xlu1 %v3510_v10 }
 0x20e   :  { %1078 = vperm.xlu1 %2009, %v2531_v33   ;;  %1297 = vrot.lane.b32.xlu0 %v1261_v19, %s2110_s11  ;;  %v2779_v19 = vld [vmem:[%s3494_s3 + $0x58] sm:$0xff]  ;;  %v2798_v10 = vpop.permute.xlu0 %1226 }
 0x210   :  { %v2765_v11 = vpop.permute.xlu1 %642 }
 0x212   :  { %2010 = vset.pattern.permute.xlu1 %v3508_v15  ;;  %563 = vrot.lane.b32.xlu0 %v526_v39, %s2109_s10  ;;  %v1102_v39 = vmul.f32 %v1055_v51, %v2779_v19  ;;  %v3539_v51 = vmov 1  }
 0x213   :  { %1238 = vperm.xlu1 %2010, %v2531_v33  }
 0x215   :  { %v2773_v61 = vpop.permute.xlu1 %802 }
 0x216   :  { %883 = vrot.lane.b32.xlu0 %v846_v60, %s2111_s18  ;;  %v528_v60 = vmul.f32 %v487_v16, %v2784_v46  ;;  %v2806_v16 = vpop.permute.xlu0 %403 }
 0x217   :  { %2011 = vset.pattern.permute.xlu1 %v3512_v14  ;;  %3540 = vst [vmem:[#allocation24_spill] sm:$0xff] %v2806_v16 }
 0x218   :  { %1398 = vperm.xlu1 %2011, %v2531_v33  }
 0x21a   :  { %v2792_v15 = vpop.permute.xlu1 %1378  ;;  %1139 = vrot.lane.b32.xlu0 %v1102_v39, %s2109_s10 }
 0x21c   :  { %2012 = vset.pattern.permute.xlu1 %v3514_v20  ;;  %v495_v20 = vpop.permute.xlu0 %494 }
 0x21d   :  { %418 = vperm.xlu1 %2012, %v2531_v33   ;;  %v2813_v33 = vld [vmem:[%s3494_s3 + $0x90] sm:$0xff] }
 0x21e   :  { %567 = vrot.lane.b32.xlu0 %v528_v60, %s2109_s10  ;;  %v530_v35 = vmul.f32 %v495_v20, %v2813_v33 }
 0x21f   :  { %v2800_v14 = vpop.permute.xlu1 %962 }
 0x220   :  { %3538 = vst [vmem:[#allocation23_spill] sm:$0xff] %v2800_v14  ;;  %v3542_v14 = vmov 3  }
 0x221   :  { %2013 = vset.pattern.permute.xlu1 %v3539_v51 }
 0x222   :  { %506 = vperm.xlu1 %2013, %v2542_v37  }
 0x224   :  { %v2804_v53 = vpop.permute.xlu1 %646 }
 0x226   :  { %2014 = vset.pattern.permute.xlu1 %v3541_v22 }
 0x227   :  { %666 = vperm.xlu1 %2014, %v2542_v37  }
 0x229   :  { %v807_v39 = vpop.permute.xlu1 %806 }
 0x22a   :  { %v848_v60 = vmul.f32 %v807_v39, %v2784_v46 }
 0x22b   :  { %2015 = vset.pattern.permute.xlu1 %v3542_v14 }
 0x22c   :  { %826 = vperm.xlu1 %2015, %v2542_v37   ;;  %887 = vrot.lane.b32.xlu0 %v848_v60, %s2111_s18  ;;  %v2837_v60 = vpop.permute.xlu0 %1390 }
 0x22d   :  { %3547 = vst [vmem:[#allocation27_spill] sm:$0xff] %v2837_v60 }
 0x22e   :  { %v1063_v16 = vpop.permute.xlu1 %1062 }
 0x230   :  { %2016 = vset.pattern.permute.xlu1 %v3543_v18  ;;  %571 = vrot.lane.b32.xlu0 %v530_v35, %s2109_s10 }
 0x231   :  { %1082 = vperm.xlu1 %2016, %v2542_v37  }
 0x233   :  { %v2823_v59 = vpop.permute.xlu1 %1222 }
 0x234   :  { %3544 = vst [vmem:[#allocation25_spill] sm:$0xff] %v2823_v59 }
 0x235   :  { %2017 = vset.pattern.permute.xlu1 %v3545_v30 }
 0x236   :  { %1242 = vperm.xlu1 %2017, %v2542_v37  }
 0x238   :  { %v2827_v39 = vpop.permute.xlu1 %398 }
 0x239   :  { %3546 = vst [vmem:[#allocation26_spill] sm:$0xff] %v2827_v39  ;;  %v2843_v39 = vpop.permute.xlu0 %1074 }
 0x23a   :  { %2021 = vset.pattern.permute.xlu1 %v3541_v22 }
 0x23b   :  { %670 = vperm.xlu1 %2021, %v2563_v44  }
 0x23d   :  { %v2831_v20 = vpop.permute.xlu1 %490  ;;  %v2850_v34 = vpop.permute.xlu0 %1234 }
 0x23f   :  { %2022 = vset.pattern.permute.xlu1 %v3542_v14 }
 0x240   :  { %830 = vperm.xlu1 %2022, %v2563_v44  }
 0x241   :  { %v2857_v59 = vpop.permute.xlu0 %1394 }
 0x242   :  { %v2835_v35 = vpop.permute.xlu1 %650  ;;  %3551 = vst [vmem:[#allocation29_spill] sm:$0xff] %v2857_v59 }
 0x244   :  { %2023 = vset.pattern.permute.xlu1 %v3543_v18 }
 0x245   :  { %1086 = vperm.xlu1 %2023, %v2563_v44   ;;  %v2863_v31 = vpop.permute.xlu0 %413 }
 0x246   :  { %3552 = vst [vmem:[#allocation30_spill] sm:$0xff] %v2863_v31 }
 0x247   :  { %v2841_v5 = vpop.permute.xlu1 %810 }
 0x249   :  { %2025 = vset.pattern.permute.xlu1 %v3548_v45 }
 0x24a   :  { %1406 = vperm.xlu1 %2025, %v2563_v44  }
 0x24c   :  { %v2847_v26 = vpop.permute.xlu1 %1386 }
 0x24e   :  { %2026 = vset.pattern.permute.xlu1 %v3549_v50 }
 0x24f   :  { %428 = vperm.xlu1 %2026, %v2563_v44  }
 0x251   :  { %v2853_v60 = vpop.permute.xlu1 %970 }
 0x252   :  { %3550 = vst [vmem:[#allocation28_spill] sm:$0xff] %v2853_v60  ;;  %v2877_v60 = vld [vmem:[%s3494_s3 + $0xb0] sm:$0xff] }
 0x253   :  { %2027 = vset.pattern.permute.xlu1 %v3539_v51  ;;  %v2872_v51 = vld [vmem:[%s3494_s3 + $0x78] sm:$0xff] }
 0x254   :  { %514 = vperm.xlu1 %2027, %v2584_v47   ;;  %v1104_v31 = vmul.f32 %v1063_v16, %v2872_v51  ;;  %v1422_v16 = vmul.f32 %v2705_v54, %v2779_v19 }
 0x256   :  { %v2859_v23 = vpop.permute.xlu1 %654 }
 0x258   :  { %2028 = vset.pattern.permute.xlu1 %v3541_v22 }
 0x259   :  { %674 = vperm.xlu1 %2028, %v2584_v47  }
 0x25b   :  { %v815_v37 = vpop.permute.xlu1 %814 }
 0x25c   :  { %v850_v6 = vmul.f32 %v815_v37, %v2813_v33  ;;  %v503_v37 = vpop.permute.xlu0 %502 }
 0x25d   :  { %2029 = vset.pattern.permute.xlu1 %v3542_v14  ;;  %v532_v14 = vmul.f32 %v503_v37, %v2877_v60 }
 0x25e   :  { %834 = vperm.xlu1 %2029, %v2584_v47   ;;  %891 = vrot.lane.b32.xlu0 %v850_v6, %s2111_s18 }
 0x260   :  { %v2880_v59 = vpop.permute.xlu1 %1070 }
 0x261   :  { %3553 = vst [vmem:[#allocation31_spill] sm:$0xff] %v2880_v59 }
 0x262   :  { %2030 = vset.pattern.permute.xlu1 %v3543_v18  ;;  %1143 = vrot.lane.b32.xlu0 %v1104_v31, %s2109_s10  ;;  %v2900_v31 = vld [vmem:[%s3494_s3 + $0x68] sm:$0xff] }
 0x263   :  { %1090 = vperm.xlu1 %2030, %v2584_v47   ;;  %v1263_v54 = vmul.f32 %v2730_v28, %v2900_v31  ;;  %v841_v28 = vmul.f32 %v2502_v24, %v2642_v57  ;;  %v522_v24 = vmul.f32 %v2538_v36, %v2675_v8  ;;  %v2954_v36 = vld [vmem:[%s3494_s3 + $0x20] sm:$0xff] }
 0x265   :  { %v2886_v6 = vpop.permute.xlu1 %1230 }
 0x266   :  { %575 = vrot.lane.b32.xlu0 %v532_v14, %s2109_s10 }
 0x267   :  { %2031 = vset.pattern.permute.xlu1 %v3545_v30 }
 0x268   :  { %1250 = vperm.xlu1 %2031, %v2584_v47  }
 0x26a   :  { %v2893_v59 = vpop.permute.xlu1 %408  ;;  %1459 = vrot.lane.b32.xlu0 %v1422_v16, %s2111_s18  ;;  %v1097_v16 = vmul.f32 %v2477_v13, %v2662_v21  ;;  %v682_v13 = vmul.f32 %v2504_v25, %v2675_v8  ;;  %v523_v25 = vmul.f32 %v2589_v55, %v2954_v36  ;;  %v843_v55 = vmul.f32 %v2601_v0, %v2954_v36  ;;  %v2992_v0 = vld [vmem:[%s3494_s3 + $0x88] sm:$0xff] }
 0x26b   :  { %3554 = vst [vmem:[#allocation32_spill] sm:$0xff] %v2893_v59  ;;  %v2971_v59 = vld [vmem:[%s3494_s3 + $0xc0] sm:$0xff] }
 0x26c   :  { %2032 = vset.pattern.permute.xlu1 %v3548_v45  ;;  %3560 = vst [vmem:[#allocation37_spill] sm:$0xff] %v2971_v59 }
 0x26d   :  { %1410 = vperm.xlu1 %2032, %v2584_v47  }
 0x26e   :  { %990 = vperm.xlu0 %2039, %v2563_v44  }
 0x26f   :  { %v2904_v30 = vpop.permute.xlu1 %498 }
 0x271   :  { %2035 = vset.pattern.permute.xlu1 %v3541_v22 }
 0x272   :  { %678 = vperm.xlu1 %2035, %v2595_v62   ;;  %1301 = vrot.lane.b32.xlu0 %v1263_v54, %s2110_s11 }
 0x274   :  { %v2911_v37 = vpop.permute.xlu1 %658 }
 0x276   :  { %2037 = vset.pattern.permute.xlu1 %v3543_v18  ;;  %v3556_v18 = vmov 4  }
 0x277   :  { %1094 = vperm.xlu1 %2037, %v2595_v62  }
 0x279   :  { %v819_v14 = vpop.permute.xlu1 %818 }
 0x27b   :  { %2040 = vset.pattern.permute.xlu1 %v3548_v45 }
 0x27c   :  { %1414 = vperm.xlu1 %2040, %v2595_v62  }
 0x27e   :  { %v2917_v44 = vpop.permute.xlu1 %978 }
 0x27f   :  { %3555 = vst [vmem:[#allocation33_spill] sm:$0xff] %v2917_v44 }
 0x280   :  { %2041 = vset.pattern.permute.xlu1 %v3549_v50  ;;  %v1417_v50 = vmul.f32 %v2485_v17, %v2662_v21  ;;  %v1258_v17 = vmul.f32 %v2520_v29, %v2683_v27  ;;  %v683_v29 = vmul.f32 %v2544_v38, %v2954_v36  ;;  %v2981_v38 = vld [vmem:[%s3494_s3 + $0xa0] sm:$0xff] }
 0x281   :  { %438 = vperm.xlu1 %2041, %v2595_v62   ;;  %3561 = vst [vmem:[#allocation38_spill] sm:$0xff] %v2981_v38 }
 0x283   :  { %v2923_v22 = vpop.permute.xlu1 %662 }
 0x285   :  { %873 = vrot.lane.b32.xlu1 %v841_v28, %s2111_s18 }
 0x286   :  { %2042 = vset.pattern.permute.xlu1 %v3556_v18  ;;  %v2944_v18 = vpop.permute.xlu0 %1402 }
 0x288   :  { %v2929_v54 = vpop.permute.xlu1 %822 }
 0x289   :  { %1129 = vrot.lane.b32.xlu1 %v1097_v16, %s2109_s10 }
 0x28d   :  { %v2934_v44 = vpop.permute.xlu1 %1078  ;;  %1449 = vrot.lane.b32.xlu1 %v1417_v50, %s2111_s18  ;;  %v2957_v50 = vpop.permute.xlu0 %423 }
 0x28e   :  { %3558 = vst [vmem:[#allocation35_spill] sm:$0xff] %v2957_v50 }
 0x291   :  { %555 = vrot.lane.b32.xlu1 %v522_v24, %s2109_s10 }
 0x292   :  { %v2940_v28 = vpop.permute.xlu1 %1238 }
 0x295   :  { %715 = vrot.lane.b32.xlu1 %v682_v13, %s2110_s11  ;;  %v2966_v13 = vpop.permute.xlu0 %510 }
 0x297   :  { %v2949_v16 = vpop.permute.xlu1 %1398 }
 0x298   :  { %3557 = vst [vmem:[#allocation34_spill] sm:$0xff] %v2949_v16 }
 0x299   :  { %1291 = vrot.lane.b32.xlu1 %v1258_v17, %s2110_s11 }
 0x29c   :  { %v2961_v24 = vpop.permute.xlu1 %418 }
 0x29d   :  { %3559 = vst [vmem:[#allocation36_spill] sm:$0xff] %v2961_v24  ;;  %557 = vrot.lane.b32.xlu1 %v523_v25, %s2109_s10  ;;  %v2984_v25 = vpop.permute.xlu0 %1246  ;;  %v851_v24 = vmul.f32 %v819_v14, %v2981_v38 }
 0x2a1   :  { %v507_v17 = vpop.permute.xlu1 %506  ;;  %717 = vrot.lane.b32.xlu1 %v683_v29, %s2110_s11  ;;  %v1099_v29 = vmul.f32 %v2611_v58, %v2703_v40  ;;  %v1423_v58 = vmul.f32 %v2792_v15, %v2900_v31 }
 0x2a2   :  { %v533_v50 = vmul.f32 %v507_v17, %v2971_v59  ;;  %v1419_v17 = vmul.f32 %v2554_v41, %v2703_v40 }
 0x2a4   :  { %577 = vrot.lane.b32.xlu0 %v533_v50, %s2109_s10  ;;  %v1105_v50 = vmul.f32 %v2789_v2, %v2992_v0  ;;  %v1260_v2 = vmul.f32 %v2605_v56, %v2728_v52 }
 0x2a5   :  { %877 = vrot.lane.b32.xlu1 %v843_v55, %s2111_s18  ;;  %v3000_v55 = vpop.permute.xlu0 %433 }
 0x2a6   :  { %v667_v16 = vpop.permute.xlu1 %666  ;;  %3562 = vst [vmem:[#allocation39_spill] sm:$0xff] %v3000_v55 }
 0x2a8   :  { %893 = vrot.lane.b32.xlu0 %v851_v24, %s2111_s18  ;;  %v684_v24 = vmul.f32 %v2635_v9, %v2711_v43  ;;  %v693_v9 = vmul.f32 %v667_v16, %v2971_v59 }
 0x2a9   :  { %1133 = vrot.lane.b32.xlu1 %v1099_v29, %s2109_s10  ;;  %v3012_v41 = vpop.permute.xlu0 %518 }
 0x2ab   :  { %v827_v14 = vpop.permute.xlu1 %826 }
 0x2ac   :  { %1145 = vrot.lane.b32.xlu0 %v1105_v50, %s2109_s10  ;;  %v3019_v50 = vld [vmem:[%s3494_s3 + $0x40] sm:$0xff] }
 0x2ad   :  { %1453 = vrot.lane.b32.xlu1 %v1419_v17, %s2111_s18  ;;  %v525_v17 = vmul.f32 %v2619_v1, %v3019_v50  ;;  %v845_v16 = vmul.f32 %v2632_v7, %v3019_v50 }
 0x2b0   :  { %v3008_v29 = vpop.permute.xlu1 %1082  ;;  %1461 = vrot.lane.b32.xlu0 %v1423_v58, %s2111_s18  ;;  %v3028_v58 = vpop.permute.xlu0 %838 }
 0x2b1   :  { %719 = vrot.lane.b32.xlu1 %v684_v24, %s2110_s11  ;;  %v685_v24 = vmul.f32 %v2625_v4, %v3019_v50  ;;  %v686_v4 = vmul.f32 %v2692_v12, %v2759_v48 }
 0x2b4   :  { %994 = vperm.xlu0 %2039, %v2584_v47   ;;  %v1265_v47 = vmul.f32 %v2798_v10, %v2992_v0  ;;  %v3041_v1 = vpop.permute.xlu0 %1254  ;;  %v1101_v10 = vmul.f32 %v2685_v42, %v2751_v49  ;;  %v3068_v42 = vld [vmem:[%s3494_s3 + $0x60] sm:$0xff] }
 0x2b5   :  { %v3022_v15 = vpop.permute.xlu1 %1242  ;;  %1295 = vrot.lane.b32.xlu1 %v1260_v2, %s2110_s11  ;;  %v527_v12 = vmul.f32 %v2753_v63, %v3068_v42  ;;  %v847_v63 = vmul.f32 %v2773_v61, %v3068_v42 }
 0x2b8   :  { %737 = vrot.lane.b32.xlu0 %v693_v9, %s2110_s11 }
 0x2b9   :  { %561 = vrot.lane.b32.xlu1 %v525_v17, %s2109_s10  ;;  %2043 = vset.pattern.permute.xlu0 %v3548_v45  ;;  %v3050_v45 = vpop.permute.xlu0 %958 }
 0x2ba   :  { %v3035_v56 = vpop.permute.xlu1 %670 }
 0x2bc   :  { %1305 = vrot.lane.b32.xlu0 %v1265_v47, %s2110_s11  ;;  %v1262_v47 = vmul.f32 %v2732_v3, %v2779_v19  ;;  %v3082_v3 = vld [vmem:[%s3494_s3 + $0xe0] sm:$0xff] }
 0x2bd   :  { %721 = vrot.lane.b32.xlu1 %v685_v24, %s2110_s11  ;;  %v3060_v7 = vpop.permute.xlu0 %966  ;;  %3565 = vst [vmem:[#allocation42_spill] sm:$0xff] %v3082_v3 }
 0x2bf   :  { %v3045_v2 = vpop.permute.xlu1 %830 }
 0x2c1   :  { %881 = vrot.lane.b32.xlu1 %v845_v16, %s2111_s18  ;;  %v3074_v16 = vpop.permute.xlu0 %974 }
 0x2c2   :  { %3564 = vst [vmem:[#allocation41_spill] sm:$0xff] %v3074_v16 }
 0x2c4   :  { %v3052_v9 = vpop.permute.xlu1 %1086 }
 0x2c5   :  { %1137 = vrot.lane.b32.xlu1 %v1101_v10, %s2109_s10  ;;  %v687_v10 = vmul.f32 %v2765_v11, %v3068_v42  ;;  %v3086_v55 = vpop.permute.xlu0 %982 }
 0x2c9   :  { %v3057_v17 = vpop.permute.xlu1 %1406  ;;  %723 = vrot.lane.b32.xlu1 %v686_v4, %s2110_s11 }
 0x2cd   :  { %1299 = vrot.lane.b32.xlu1 %v1262_v47, %s2110_s11 }
 0x2ce   :  { %v3070_v24 = vpop.permute.xlu1 %428 }
 0x2cf   :  { %3563 = vst [vmem:[#allocation40_spill] sm:$0xff] %v3070_v24  ;;  %v3095_v24 = vld [vmem:[%s3494_s3 + $0xa8] sm:$0xff] }
 0x2d0   :  { %3566 = vst [vmem:[#allocation43_spill] sm:$0xff] %v3095_v24 }
 0x2d1   :  { %565 = vrot.lane.b32.xlu1 %v527_v12, %s2109_s10  ;;  %v853_v12 = vmul.f32 %v827_v14, %v2971_v59  ;;  %v688_v14 = vmul.f32 %v2804_v53, %v2784_v46 }
 0x2d3   :  { %v515_v4 = vpop.permute.xlu1 %514 }
 0x2d4   :  { %v535_v47 = vmul.f32 %v515_v4, %v3082_v3  ;;  %v1107_v4 = vmul.f32 %v2843_v39, %v3095_v24 }
 0x2d5   :  { %725 = vrot.lane.b32.xlu1 %v687_v10, %s2110_s11  ;;  %v1103_v10 = vmul.f32 %v2716_v32, %v2900_v31  ;;  %v3113_v32 = vld [vmem:[%s3494_s3 + $0x80] sm:$0xff] }
 0x2d6   :  { %581 = vrot.lane.b32.xlu0 %v535_v47, %s2109_s10  ;;  %v554_v47 = vpop.permute.xlu0 %553  ;;  %v689_v53 = vmul.f32 %v2835_v35, %v3113_v32  ;;  %v690_v35 = vmul.f32 %v2859_v23, %v2813_v33  ;;  %v3569_v23 = vld [vmem:[#allocation16_spill] sm:$0xff] }
 0x2d8   :  { %v675_v11 = vpop.permute.xlu1 %674 }
 0x2d9   :  { %885 = vrot.lane.b32.xlu1 %v847_v63, %s2111_s18  ;;  %v1425_v63 = vmul.f32 %v2847_v26, %v2992_v0 }
 0x2da   :  { %897 = vrot.lane.b32.xlu0 %v853_v12, %s2111_s18  ;;  %v714_v39 = vpop.permute.xlu0 %713 }
 0x2dd   :  { %v835_v61 = vpop.permute.xlu1 %834  ;;  %1141 = vrot.lane.b32.xlu1 %v1103_v10, %s2109_s10  ;;  %v529_v10 = vmul.f32 %v2831_v20, %v3113_v32  ;;  %v849_v20 = vmul.f32 %v2841_v5, %v3113_v32 }
 0x2de   :  { %1149 = vrot.lane.b32.xlu0 %v1107_v4, %s2109_s10  ;;  %v695_v4 = vmul.f32 %v675_v11, %v3082_v3  ;;  %v3125_v59 = vpop.permute.xlu0 %1289  ;;  %v855_v11 = vmul.f32 %v835_v61, %v3082_v3  ;;  %v531_v61 = vmul.f32 %v2904_v30, %v2981_v38  ;;  %v3164_v30 = vld [vmem:[%s3494_s3 + $0xe8] sm:$0xff]  ;;  %v691_v3 = vmul.f32 %v2911_v37, %v2981_v38 }
 0x2df   :  { %v3574_v37 = vld [vmem:[#allocation8_spill] sm:$0xff] }
 0x2e1   :  { %727 = vrot.lane.b32.xlu1 %v688_v14, %s2110_s11  ;;  %v1267_v14 = vmul.f32 %v2850_v34, %v3095_v24  ;;  %v3139_v34 = vld [vmem:[%s3494_s3 + $0xc8] sm:$0xff] }
 0x2e2   :  { %v1091_v12 = vpop.permute.xlu1 %1090  ;;  %1465 = vrot.lane.b32.xlu0 %v1425_v63, %s2111_s18  ;;  %3567 = vst [vmem:[#allocation44_spill] sm:$0xff] %v3139_v34  ;;  %v1109_v5 = vmul.f32 %v3008_v29, %v3139_v34  ;;  %v1421_v29 = vmul.f32 %v3569_v23, %v2751_v49 }
 0x2e5   :  { %569 = vrot.lane.b32.xlu1 %v529_v10, %s2109_s10  ;;  %v3133_v10 = vpop.permute.xlu0 %875 }
 0x2e6   :  { %741 = vrot.lane.b32.xlu0 %v695_v4, %s2110_s11 }
 0x2e7   :  { %v1251_v26 = vpop.permute.xlu1 %1250 }
 0x2e9   :  { %729 = vrot.lane.b32.xlu1 %v689_v53, %s2110_s11  ;;  %v3568_v53 = vld [vmem:[#allocation29_spill] sm:$0xff] }
 0x2ea   :  { %1309 = vrot.lane.b32.xlu0 %v1267_v14, %s2110_s11  ;;  %v1427_v14 = vmul.f32 %v3568_v53, %v3095_v24  ;;  %3570 = vst [vmem:[#allocation29_spill] sm:$0xff] %v3164_v30  ;;  %v1111_v53 = vmul.f32 %v1091_v12, %v3164_v30 }
 0x2ec   :  { %v1411_v63 = vpop.permute.xlu1 %1410 }
 0x2ed   :  { %889 = vrot.lane.b32.xlu1 %v849_v20, %s2111_s18  ;;  %v1132_v20 = vpop.permute.xlu0 %1131 }
 0x2ee   :  { %901 = vrot.lane.b32.xlu0 %v855_v11, %s2111_s18 }
 0x2f1   :  { %v3145_v4 = vpop.permute.xlu1 %678  ;;  %731 = vrot.lane.b32.xlu1 %v690_v35, %s2110_s11  ;;  %v1269_v35 = vmul.f32 %v3022_v15, %v3139_v34  ;;  %v3572_v15 = vld [vmem:[#allocation9_spill] sm:$0xff] }
 0x2f2   :  { %1153 = vrot.lane.b32.xlu0 %v1109_v5, %s2109_s10  ;;  %v1452_v5 = vpop.permute.xlu0 %1451  ;;  %v441_v23 = vmul.f32 %v3572_v15, %v2642_v57  ;;  %v1271_v57 = vmul.f32 %v1251_v26, %v3164_v30  ;;  %v1001_v15 = vmul.f32 %v3574_v37, %v2662_v21  ;;  %v3577_v37 = vld [vmem:[#allocation31_spill] sm:$0xff] }
 0x2f4   :  { %v601_v16 = vadd.f32 %v554_v47, %v441_v23 }
 0x2f5   :  { %573 = vrot.lane.b32.xlu1 %v531_v61, %s2109_s10 }
 0x2f6   :  { %v3154_v11 = vpop.permute.xlu1 %1094  ;;  %1469 = vrot.lane.b32.xlu0 %v1427_v14, %s2111_s18  ;;  %v3571_v14 = vld [vmem:[#allocation11_spill] sm:$0xff]  ;;  %v3179_v24 = vpop.permute.xlu0 %1293  ;;  %v761_v12 = vadd.f32 %v714_v39, %v601_v16  ;;  %v1431_v39 = vmul.f32 %v1411_v63, %v3164_v30 }
 0x2f9   :  { %1457 = vrot.lane.b32.xlu1 %v1421_v29, %s2111_s18  ;;  %v1429_v29 = vmul.f32 %v2944_v18, %v3139_v34 }
 0x2fa   :  { %1313 = vrot.lane.b32.xlu0 %v1269_v35, %s2110_s11  ;;  %v3191_v34 = vpop.permute.xlu0 %559 }
 0x2fb   :  { %v3168_v61 = vpop.permute.xlu1 %1414 }
 0x2fd   :  { %986 = vperm.xlu1 %2042, %v3571_v14  }
 0x2fe   :  { %1157 = vrot.lane.b32.xlu0 %v1111_v53, %s2109_s10  ;;  %v692_v53 = vmul.f32 %v2923_v22, %v2877_v60  ;;  %v3199_v22 = vld [vmem:[%s3494_s3 + $0xd0] sm:$0xff]  ;;  %v3206_v23 = vpop.permute.xlu0 %879 }
 0x2ff   :  { %v534_v21 = vmul.f32 %v2966_v13, %v3199_v22 }
 0x300   :  { %v3181_v35 = vpop.permute.xlu1 %438 }
 0x301   :  { %3573 = vst [vmem:[#allocation16_spill] sm:$0xff] %v3181_v35  ;;  %733 = vrot.lane.b32.xlu1 %v691_v3, %s2110_s11  ;;  %v3575_v3 = vld [vmem:[#allocation25_spill] sm:$0xff] }
 0x302   :  { %1473 = vrot.lane.b32.xlu0 %v1429_v29, %s2111_s18  ;;  %v1264_v47 = vmul.f32 %v3575_v3, %v2872_v51  ;;  %v3219_v13 = vpop.permute.xlu0 %1135 }
 0x304   :  { %v874_v14 = vpop.permute.xlu1 %873 }
 0x305   :  { %v921_v18 = vadd.f32 %v874_v14, %v761_v12  ;;  %735 = vrot.lane.b32.xlu1 %v692_v53, %s2110_s11  ;;  %v852_v12 = vmul.f32 %v2929_v54, %v2877_v60  ;;  %v3217_v14 = vld [vmem:[%s3494_s3 + $0x98] sm:$0xff]  ;;  %v3578_v54 = vld [vmem:[#allocation13_spill] sm:$0xff] }
 0x306   :  { %1317 = vrot.lane.b32.xlu0 %v1271_v57, %s2110_s11  ;;  %v3576_v57 = vld [vmem:[#allocation10_spill] sm:$0xff]  ;;  %v1456_v30 = vpop.permute.xlu0 %1455 }
 0x307   :  { %v1017_v16 = vadd.f32 %v1001_v15, %v921_v18  ;;  %v442_v63 = vmul.f32 %v3576_v57, %v2675_v8  ;;  %v1106_v15 = vmul.f32 %v3577_v37, %v3217_v14  ;;  %v1002_v8 = vmul.f32 %v3578_v54, %v2683_v27  ;;  %v3580_v27 = vld [vmem:[#allocation12_spill] sm:$0xff] }
 0x308   :  { %v1130_v26 = vpop.permute.xlu1 %1129 }
 0x309   :  { %1303 = vrot.lane.b32.xlu1 %v1264_v47, %s2110_s11 }
 0x30a   :  { %1477 = vrot.lane.b32.xlu0 %v1431_v39, %s2111_s18  ;;  %v3579_v39 = vld [vmem:[#allocation22_spill] sm:$0xff] }
 0x30c   :  { %v1450_v29 = vpop.permute.xlu1 %1449 }
 0x30d   :  { %579 = vrot.lane.b32.xlu1 %v534_v21, %s2109_s10  ;;  %v1424_v21 = vmul.f32 %v3579_v39, %v2872_v51 }
 0x310   :  { %v556_v53 = vpop.permute.xlu1 %555 }
 0x311   :  { %895 = vrot.lane.b32.xlu1 %v852_v12, %s2111_s18  ;;  %v602_v18 = vadd.f32 %v556_v53, %v442_v63  ;;  %v1177_v12 = vadd.f32 %v1130_v26, %v1017_v16 }
 0x313   :  { %v1337_v53 = vadd.f32 %v3125_v59, %v1177_v12 }
 0x314   :  { %v716_v3 = vpop.permute.xlu1 %715 }
 0x315   :  { %v762_v47 = vadd.f32 %v716_v3, %v602_v18  ;;  %1147 = vrot.lane.b32.xlu1 %v1106_v15, %s2109_s10  ;;  %v3232_v15 = vpop.permute.xlu0 %1297  ;;  %v443_v3 = vmul.f32 %v3580_v27, %v2954_v36  ;;  %v1497_v16 = vadd.f32 %v1450_v29, %v1337_v53 }
 0x317   :  { %v922_v57 = vadd.f32 %v3133_v10, %v762_v47  ;;  %v694_v10 = vmul.f32 %v3035_v56, %v3199_v22 }
 0x318   :  { %v1292_v35 = vpop.permute.xlu1 %1291 }
 0x319   :  { %v1018_v38 = vadd.f32 %v1002_v8, %v922_v57  ;;  %1463 = vrot.lane.b32.xlu1 %v1424_v21, %s2111_s18  ;;  %v3246_v36 = vpop.permute.xlu0 %563  ;;  %v854_v57 = vmul.f32 %v3045_v2, %v3199_v22 }
 0x31b   :  { %v1178_v63 = vadd.f32 %v1132_v20, %v1018_v38  ;;  %v1266_v38 = vmul.f32 %v2886_v6, %v3217_v14 }
 0x31c   :  { %v558_v37 = vpop.permute.xlu1 %557 }
 0x31d   :  { %v1338_v18 = vadd.f32 %v1292_v35, %v1178_v63  ;;  %998 = vperm.xlu1 %2042, %v2595_v62   ;;  %v603_v54 = vadd.f32 %v558_v37, %v443_v3  ;;  %v3244_v62 = vld [vmem:[%s3494_s3 + $0xf0] sm:$0xff]  ;;  %v3581_v35 = vmov 0.0|0.0   ;;  %v3255_v12 = vpop.permute.xlu0 %883 }
 0x31e   :  { %v536_v6 = vmul.f32 %v3012_v41, %v3244_v62  ;;  %v3583_v63 = vld [vmem:[#allocation18_spill] sm:$0xff] }
 0x31f   :  { %v1498_v26 = vadd.f32 %v1452_v5, %v1338_v18  ;;  %v3582_v5 = vld [vmem:[#allocation15_spill] sm:$0xff]  ;;  %v444_v37 = vmul.f32 %v3583_v63, %v2711_v43  ;;  %v3584_v43 = vld [vmem:[#allocation14_spill] sm:$0xff] }
 0x320   :  { %v718_v47 = vpop.permute.xlu1 %717  ;;  %v1003_v29 = vmul.f32 %v3582_v5, %v2703_v40  ;;  %v3265_v40 = vld [vmem:[%s3494_s3 + $0xb8] sm:$0xff] }
 0x321   :  { %739 = vrot.lane.b32.xlu1 %v694_v10, %s2110_s11  ;;  %v1874_v59 = vpack.c.bf16 %v1498_v26, %v1497_v16  ;;  %v763_v20 = vadd.f32 %v718_v47, %v603_v54  ;;  %v604_v41 = vadd.f32 %v3191_v34, %v444_v37  ;;  %v1108_v18 = vmul.f32 %v2934_v44, %v3265_v40  ;;  %v3270_v27 = vpop.permute.xlu0 %1139  ;;  %v3585_v16 = vld [vmem:[#allocation27_spill] sm:$0xff] }
 0x322   :  { %v1004_v10 = vmul.f32 %v3584_v43, %v2728_v52  ;;  %v1426_v26 = vmul.f32 %v3585_v16, %v3217_v14  ;;  %v3588_v43 = vld [vmem:[#allocation34_spill] sm:$0xff] }
 0x323   :  { %1875 = vmatpush3.bf16.msra.mxu1 %v1874_v59 }
 0x324   :  { %v878_v56 = vpop.permute.xlu1 %877  ;;  %1876 = vmatprep.subr.bf16.mxu1 %v3581_v35 }
 0x325   :  { %v923_v8 = vadd.f32 %v878_v56, %v763_v20  ;;  %1307 = vrot.lane.b32.xlu1 %v1266_v38, %s2110_s11  ;;  %v3279_v44 = vpop.permute.xlu0 %567  ;;  %v696_v38 = vmul.f32 %v3145_v4, %v3244_v62 }
 0x327   :  { %v1019_v39 = vadd.f32 %v1003_v29, %v923_v8  ;;  %v3586_v29 = vld [vmem:[#allocation17_spill] sm:$0xff]  ;;  %v1268_v8 = vmul.f32 %v2940_v28, %v3265_v40 }
 0x328   :  { %v1134_v21 = vpop.permute.xlu1 %1133 }
 0x329   :  { %583 = vrot.lane.b32.xlu1 %v536_v6, %s2109_s10  ;;  %v1179_v47 = vadd.f32 %v1134_v21, %v1019_v39  ;;  %v3290_v21 = vpop.permute.xlu0 %887 }
 0x32b   :  { %v1339_v20 = vadd.f32 %v3179_v24, %v1179_v47 }
 0x32c   :  { %v1454_v53 = vpop.permute.xlu1 %1453 }
 0x32d   :  { %899 = vrot.lane.b32.xlu1 %v854_v57, %s2111_s18  ;;  %v1499_v6 = vadd.f32 %v1454_v53, %v1339_v20 }
 0x330   :  { %v720_v3 = vpop.permute.xlu1 %719 }
 0x331   :  { %v764_v2 = vadd.f32 %v720_v3, %v604_v41  ;;  %1151 = vrot.lane.b32.xlu1 %v1108_v18, %s2109_s10  ;;  %v572_v41 = vpop.permute.xlu0 %571 }
 0x333   :  { %v924_v54 = vadd.f32 %v3206_v23, %v764_v2  ;;  %v445_v23 = vmul.f32 %v3586_v29, %v3019_v50  ;;  %v3587_v50 = vld [vmem:[#allocation19_spill] sm:$0xff] }
 0x334   :  { %v1296_v59 = vpop.permute.xlu1 %1295  ;;  %v1005_v28 = vmul.f32 %v3587_v50, %v2751_v49  ;;  %v1428_v49 = vmul.f32 %v3588_v43, %v3265_v40 }
 0x335   :  { %v1020_v34 = vadd.f32 %v1004_v10, %v924_v54  ;;  %1467 = vrot.lane.b32.xlu1 %v1426_v26, %s2111_s18  ;;  %v892_v2 = vpop.permute.xlu0 %891 }
 0x337   :  { %v1180_v56 = vadd.f32 %v3219_v13, %v1020_v34  ;;  %v856_v13 = vmul.f32 %v3028_v58, %v3244_v62 }
 0x338   :  { %v562_v52 = vpop.permute.xlu1 %561 }
 0x339   :  { %v1340_v5 = vadd.f32 %v1296_v59, %v1180_v56  ;;  %743 = vrot.lane.b32.xlu1 %v696_v38, %s2110_s11  ;;  %v605_v4 = vadd.f32 %v562_v52, %v445_v23  ;;  %v3312_v26 = vpop.permute.xlu0 %1143  ;;  %v3589_v23 = vld [vmem:[#allocation20_spill] sm:$0xff] }
 0x33b   :  { %v1500_v39 = vadd.f32 %v1456_v30, %v1340_v5  ;;  %v3302_v30 = vld [vmem:[%s3494_s3 + $0xd8] sm:$0xff] }
 0x33c   :  { %v722_v57 = vpop.permute.xlu1 %721  ;;  %v1110_v58 = vmul.f32 %v3052_v9, %v3302_v30  ;;  %v1270_v16 = vmul.f32 %v2984_v25, %v3302_v30  ;;  %v3318_v9 = vld [vmem:[%s3494_s3 + $0xf8] sm:$0xff]  ;;  %v1430_v25 = vmul.f32 %v3057_v17, %v3302_v30 }
 0x33d   :  { %1311 = vrot.lane.b32.xlu1 %v1268_v8, %s2110_s11  ;;  %v1877_v24 = vpack.c.bf16 %v1500_v39, %v1499_v6  ;;  %v765_v63 = vadd.f32 %v722_v57, %v605_v4  ;;  %v1112_v54 = vmul.f32 %v3154_v11, %v3318_v9  ;;  %v3323_v34 = vpop.permute.xlu0 %575  ;;  %v1272_v20 = vmul.f32 %v3041_v1, %v3318_v9  ;;  %v3590_v57 = vld [vmem:[#allocation24_spill] sm:$0xff] }
 0x33e   :  { %v1432_v11 = vmul.f32 %v3168_v61, %v3318_v9  ;;  %v446_v8 = vmul.f32 %v3589_v23, %v2759_v48  ;;  %v2113_v39 = vmov 0.0   ;;  %v449_v4 = vmul.f32 %v3590_v57, %v3113_v32 }
 0x33f   :  { %1878 = vmatpush3.bf16.msra.mxu1 %v1877_v24  ;;  %1832 = vmatprep.mubr.msk.f32.mxu1 %vm2112_vm1, %v2113_v39 }
 0x340   :  { %v882_v37 = vpop.permute.xlu1 %881  ;;  %1879 = vmatprep.subr.bf16.mxu1 %v3581_v35  ;;  %v606_v1 = vadd.f32 %v3246_v36, %v446_v8  ;;  %v1006_v36 = vmul.f32 %v3050_v45, %v2779_v19 }
 0x341   :  { %v925_v53 = vadd.f32 %v882_v37, %v765_v63  ;;  %903 = vrot.lane.b32.xlu1 %v856_v13, %s2111_s18  ;;  %v1460_v56 = vpop.permute.xlu0 %1459 }
 0x343   :  { %v1021_v18 = vadd.f32 %v1005_v28, %v925_v53 }
 0x344   :  { %v1138_v3 = vpop.permute.xlu1 %1137 }
 0x345   :  { %1155 = vrot.lane.b32.xlu1 %v1110_v58, %s2109_s10  ;;  %v3333_v5 = vpop.permute.xlu0 %990  ;;  %v3591_v58 = vld [vmem:[#allocation32_spill] sm:$0xff] }
 0x346   :  { %v450_v43 = vmul.f32 %v3591_v58, %v2813_v33  ;;  %v3594_v58 = vld [vmem:[#allocation23_spill] sm:$0xff] }
 0x348   :  { %v724_v10 = vpop.permute.xlu1 %723  ;;  %v610_v32 = vadd.f32 %v572_v41, %v450_v43  ;;  %v1007_v43 = vmul.f32 %v3594_v58, %v2900_v31  ;;  %v1012_v31 = vmul.f32 %v3086_v55, %v3265_v40  ;;  %v3598_v58 = vld [vmem:[#allocation38_spill] sm:$0xff] }
 0x349   :  { %1471 = vrot.lane.b32.xlu1 %v1428_v49, %s2111_s18  ;;  %v3340_v6 = vpop.permute.xlu0 %1301  ;;  %v766_v24 = vadd.f32 %v724_v10, %v606_v1 }
 0x34b   :  { %v926_v48 = vadd.f32 %v3255_v12, %v766_v24  ;;  %v1181_v12 = vadd.f32 %v1138_v3, %v1021_v18  ;;  %v3592_v3 = vld [vmem:[#allocation21_spill] sm:$0xff] }
 0x34c   :  { %v1300_v47 = vpop.permute.xlu1 %1299 }
 0x34d   :  { %1315 = vrot.lane.b32.xlu1 %v1270_v16, %s2110_s11  ;;  %v3347_v13 = vpop.permute.xlu0 %577  ;;  %v1022_v49 = vadd.f32 %v1006_v36, %v926_v48  ;;  %v1341_v23 = vadd.f32 %v3232_v15, %v1181_v12  ;;  %v3593_v15 = vld [vmem:[#allocation26_spill] sm:$0xff] }
 0x34e   :  { %v448_v24 = vmul.f32 %v3593_v15, %v2784_v46 }
 0x350   :  { %v566_v59 = vpop.permute.xlu1 %565 }
 0x351   :  { %1159 = vrot.lane.b32.xlu1 %v1112_v54, %s2109_s10  ;;  %v3352_v28 = vpop.permute.xlu0 %893  ;;  %v1182_v54 = vadd.f32 %v3270_v27, %v1022_v49  ;;  %v3595_v49 = vld [vmem:[#allocation36_spill] sm:$0xff] }
 0x353   :  { %v1342_v45 = vadd.f32 %v1300_v47, %v1182_v54 }
 0x354   :  { %v726_v38 = vpop.permute.xlu1 %725 }
 0x355   :  { %1475 = vrot.lane.b32.xlu1 %v1430_v25, %s2111_s18  ;;  %v1502_v1 = vadd.f32 %v1460_v56, %v1342_v45 }
 0x358   :  { %v886_v52 = vpop.permute.xlu1 %885 }
 0x359   :  { %1319 = vrot.lane.b32.xlu1 %v1272_v20, %s2110_s11  ;;  %v3359_v20 = vpop.permute.xlu0 %1145 }
 0x35c   :  { %v3335_v29 = vpop.permute.xlu1 %1141 }
 0x35d   :  { %1479 = vrot.lane.b32.xlu1 %v1432_v11, %s2111_s18  ;;  %v1462_v8 = vpop.permute.xlu0 %1461 }
 0x360   :  { %v728_v17 = vpop.permute.xlu1 %727 }
 0x361   :  { %v3366_v41 = vpop.permute.xlu0 %994 }
 0x364   :  { %v570_v61 = vpop.permute.xlu1 %569 }
 0x365   :  { %v609_v63 = vadd.f32 %v570_v61, %v449_v4  ;;  %v3371_v18 = vpop.permute.xlu0 %737 }
 0x368   :  { %v730_v37 = vpop.permute.xlu1 %729 }
 0x369   :  { %v769_v50 = vadd.f32 %v730_v37, %v609_v63  ;;  %v608_v63 = vadd.f32 %v3279_v44, %v448_v24  ;;  %v1306_v48 = vpop.permute.xlu0 %1305 }
 0x36c   :  { %v890_v53 = vpop.permute.xlu1 %889 }
 0x36d   :  { %v3356_v16 = vadd.f32 %v890_v53, %v769_v50  ;;  %v768_v53 = vadd.f32 %v728_v17, %v608_v63 }
 0x36f   :  { %v928_v44 = vadd.f32 %v3290_v21, %v768_v53 }
 0x370   :  { %v732_v10 = vpop.permute.xlu1 %731 }
 0x371   :  { %v770_v25 = vadd.f32 %v732_v10, %v610_v32  ;;  %v452_v32 = vmul.f32 %v3595_v49, %v2877_v60  ;;  %v3382_v10 = vpop.permute.xlu0 %581 }
 0x373   :  { %v3361_v11 = vadd.f32 %v892_v2, %v770_v25  ;;  %v447_v2 = vmul.f32 %v3592_v3, %v3068_v42  ;;  %v612_v46 = vadd.f32 %v3323_v34, %v452_v32 }
 0x374   :  { %v3363_v19 = vpop.permute.xlu1 %573 }
 0x375   :  { %v607_v56 = vadd.f32 %v566_v59, %v447_v2  ;;  %v898_v12 = vpop.permute.xlu0 %897 }
 0x377   :  { %v767_v37 = vadd.f32 %v726_v38, %v607_v56  ;;  %v1008_v38 = vmul.f32 %v3060_v7, %v2872_v51  ;;  %v3597_v56 = vld [vmem:[#allocation41_spill] sm:$0xff] }
 0x378   :  { %v1458_v33 = vpop.permute.xlu1 %1457  ;;  %v1010_v63 = vmul.f32 %v3597_v56, %v3217_v14 }
 0x379   :  { %v1501_v61 = vadd.f32 %v1458_v33, %v1341_v23  ;;  %v927_v36 = vadd.f32 %v886_v52, %v767_v37  ;;  %v1024_v60 = vadd.f32 %v1008_v38, %v928_v44 }
 0x37b   :  { %v1880_v57 = vpack.c.bf16 %v1502_v1, %v1501_v61  ;;  %v1023_v59 = vadd.f32 %v1007_v43, %v927_v36  ;;  %v1184_v33 = vadd.f32 %v3312_v26, %v1024_v60  ;;  %v1150_v1 = vpop.permute.xlu0 %1149  ;;  %v3599_v43 = vld [vmem:[#allocation30_spill] sm:$0xff] }
 0x37c   :  { %v3368_v4 = vpop.permute.xlu1 %986  ;;  %v451_v49 = vmul.f32 %v3599_v43, %v3598_v58 }
 0x37d   :  { %1881 = vmatpush3.bf16.msra.mxu1 %v1880_v57  ;;  %v1183_v54 = vadd.f32 %v3335_v29, %v1023_v59 }
 0x37e   :  { %1882 = vmatprep.subr.bf16.mxu1 %v3581_v35 }
 0x37f   :  { %v1343_v34 = vadd.f32 %v3340_v6, %v1183_v54  ;;  %v1466_v55 = vpop.permute.xlu0 %1465  ;;  %v3596_v6 = vld [vmem:[#allocation28_spill] sm:$0xff]  ;;  %v3601_v54 = vld [vmem:[#allocation33_spill] sm:$0xff] }
 0x380   :  { %v734_v27 = vpop.permute.xlu1 %733 }
 0x381   :  { %v1503_v51 = vadd.f32 %v1462_v8, %v1343_v34  ;;  %v3602_v34 = vld [vmem:[#allocation37_spill] sm:$0xff] }
 0x383   :  { %v3398_v29 = vpop.permute.xlu0 %741 }
 0x384   :  { %v736_v47 = vpop.permute.xlu1 %735 }
 0x385   :  { %v772_v52 = vadd.f32 %v736_v47, %v612_v46  ;;  %v1009_v47 = vmul.f32 %v3596_v6, %v2992_v0  ;;  %v611_v0 = vadd.f32 %v3363_v19, %v451_v49 }
 0x387   :  { %v1025_v15 = vadd.f32 %v1009_v47, %v3356_v16  ;;  %v1310_v24 = vpop.permute.xlu0 %1309  ;;  %v771_v44 = vadd.f32 %v734_v27, %v611_v0  ;;  %v3606_v0 = vld [vmem:[#allocation42_spill] sm:$0xff] }
 0x388   :  { %v1304_v50 = vpop.permute.xlu1 %1303 }
 0x389   :  { %v1344_v21 = vadd.f32 %v1304_v50, %v1184_v33  ;;  %v1185_v37 = vadd.f32 %v3359_v20, %v1025_v15  ;;  %v1026_v50 = vadd.f32 %v1010_v63, %v3361_v11  ;;  %v931_v20 = vadd.f32 %v3352_v28, %v771_v44  ;;  %v3600_v11 = vld [vmem:[#allocation43_spill] sm:$0xff] }
 0x38a   :  { %v1011_v60 = vmul.f32 %v3601_v54, %v3600_v11  ;;  %v3603_v33 = vld [vmem:[#allocation35_spill] sm:$0xff] }
 0x38b   :  { %v902_v36 = vpop.permute.xlu0 %901  ;;  %v1345_v46 = vadd.f32 %v1306_v48, %v1185_v37  ;;  %v453_v27 = vmul.f32 %v3603_v33, %v3602_v34 }
 0x38c   :  { %v3384_v42 = vpop.permute.xlu1 %579 }
 0x38d   :  { %v1505_v38 = vadd.f32 %v1466_v55, %v1345_v46 }
 0x390   :  { %v896_v17 = vpop.permute.xlu1 %895 }
 0x391   :  { %v932_v25 = vadd.f32 %v896_v17, %v772_v52  ;;  %v1154_v17 = vpop.permute.xlu0 %1153 }
 0x393   :  { %v1028_v45 = vadd.f32 %v1012_v31, %v932_v25 }
 0x394   :  { %v1148_v23 = vpop.permute.xlu1 %1147 }
 0x395   :  { %v1186_v32 = vadd.f32 %v1148_v23, %v1026_v50  ;;  %v1470_v25 = vpop.permute.xlu0 %1469  ;;  %v1027_v23 = vadd.f32 %v1011_v60, %v931_v20  ;;  %v3609_v60 = vld [vmem:[#allocation29_spill] sm:$0xff] }
 0x398   :  { %v1464_v61 = vpop.permute.xlu1 %1463 }
 0x399   :  { %v1504_v7 = vadd.f32 %v1464_v61, %v1344_v21  ;;  %v1187_v21 = vadd.f32 %v1150_v1, %v1027_v23  ;;  %v1314_v61 = vpop.permute.xlu0 %1313 }
 0x39b   :  { %v1883_v57 = vpack.c.bf16 %v1504_v7, %v1503_v51  ;;  %v613_v51 = vadd.f32 %v3347_v13, %v453_v27  ;;  %v3604_v7 = vld [vmem:[#allocation40_spill] sm:$0xff]  ;;  %v1347_v15 = vadd.f32 %v1310_v24, %v1187_v21 }
 0x39c   :  { %v3395_v3 = vpop.permute.xlu1 %998  ;;  %v454_v28 = vmul.f32 %v3604_v7, %v3199_v22 }
 0x39d   :  { %1884 = vmatpush3.bf16.msra.mxu1 %v1883_v57  ;;  %v773_v55 = vadd.f32 %v3371_v18, %v613_v51  ;;  %v1158_v50 = vpop.permute.xlu0 %1157  ;;  %v1507_v13 = vadd.f32 %v1470_v25, %v1347_v15  ;;  %v3607_v18 = vld [vmem:[#allocation39_spill] sm:$0xff]  ;;  %v1015_v25 = vmul.f32 %v3366_v41, %v3609_v60  ;;  %v1609_v15 = vld [vmem:[%s3495_s4 + $0x10] sm:$0xff] }
 0x39e   :  { %1885 = vmatprep.subr.bf16.mxu1 %v3581_v35  ;;  %v614_v63 = vadd.f32 %v3384_v42, %v454_v28 }
 0x39f   :  { %v933_v56 = vadd.f32 %v898_v12, %v773_v55  ;;  %v3608_v12 = vld [vmem:[#allocation16_spill] sm:$0xff] }
 0x3a0   :  { %v740_v40 = vpop.permute.xlu1 %739  ;;  %v1608_v55 = vld [vmem:[%s3495_s4 + $0x8] sm:$0xff] }
 0x3a1   :  { %v774_v43 = vadd.f32 %v740_v40, %v614_v63  ;;  %v1474_v24 = vpop.permute.xlu0 %1473  ;;  %v1513_v40 = vlaneseq }
 0x3a4   :  { %v1308_v2 = vpop.permute.xlu1 %1307 }
 0x3a5   :  { %v1346_v59 = vadd.f32 %v1308_v2, %v1186_v32  ;;  %v3605_v2 = vld [vmem:[#allocation44_spill] sm:$0xff] }
 0x3a6   :  { %v1013_v6 = vmul.f32 %v3368_v4, %v3605_v2  ;;  %v1014_v4 = vmul.f32 %v3333_v5, %v3302_v30  ;;  %v1516_v30 = vshrl.u32 %v1513_v40, 7 }
 0x3a8   :  { %v584_v26 = vpop.permute.xlu1 %583  ;;  %v1029_v58 = vadd.f32 %v1013_v6, %v933_v56  ;;  %v1519_v23 = vadd.s32 1, %v1516_v30  ;;  %v1610_v56 = vld [vmem:[%s3495_s4 + $0x18] sm:$0xff] }
 0x3a9   :  { %v1901_v63 = vpack.c.bf16 %v1610_v56, %v1609_v15 }
 0x3aa   :  { %v1189_v42 = vadd.f32 %v1154_v17, %v1029_v58  ;;  %v1318_v17 = vpop.permute.xlu0 %1317  ;;  %v1520_v51 = vmul.u32 64, %v1519_v23 }
 0x3ac   :  { %v900_v8 = vpop.permute.xlu1 %899  ;;  %v1349_v20 = vadd.f32 %v1314_v61, %v1189_v42  ;;  %v1517_v61 = vmul.u32 64, %v1516_v30 }
 0x3ad   :  { %v934_v32 = vadd.f32 %v900_v8, %v774_v43 }
 0x3b0   :  { %v1152_v53 = vpop.permute.xlu1 %1151 }
 0x3b1   :  { %v1188_v47 = vadd.f32 %v1152_v53, %v1028_v45  ;;  %v456_v45 = vmul.f32 %v3608_v12, %v3244_v62 }
 0x3b3   :  { %v616_v8 = vadd.f32 %v584_v26, %v456_v45  ;;  %v1509_v26 = vadd.f32 %v1474_v24, %v1349_v20 }
 0x3b4   :  { %v1468_v16 = vpop.permute.xlu1 %1467 }
 0x3b5   :  { %v1506_v52 = vadd.f32 %v1468_v16, %v1346_v59  ;;  %v455_v59 = vmul.f32 %v3607_v18, %v3606_v0  ;;  %v1030_v16 = vadd.f32 %v1014_v4, %v934_v32 }
 0x3b7   :  { %v1886_v14 = vpack.c.bf16 %v1506_v52, %v1505_v38  ;;  %v615_v53 = vadd.f32 %v3382_v10, %v455_v59  ;;  %v1016_v10 = vmul.f32 %v3395_v3, %v3318_v9 }
 0x3b8   :  { %v744_v31 = vpop.permute.xlu1 %743 }
 0x3b9   :  { %1887 = vmatpush3.bf16.msra.mxu1 %v1886_v14  ;;  %v775_v38 = vadd.f32 %v3398_v29, %v615_v53  ;;  %v776_v52 = vadd.f32 %v744_v31, %v616_v8 }
 0x3ba   :  { %1888 = vmatprep.subr.bf16.mxu1 %v3581_v35 }
 0x3bb   :  { %v935_v5 = vadd.f32 %v902_v36, %v775_v38  ;;  %v1478_v36 = vpop.permute.xlu0 %1477 }
 0x3bc   :  { %v1312_v48 = vpop.permute.xlu1 %1311 }
 0x3bd   :  { %v1348_v37 = vadd.f32 %v1312_v48, %v1188_v47  ;;  %v1031_v34 = vadd.f32 %v1015_v25, %v935_v5  ;;  %v2114_v47 = vmov 1.0  }
 0x3bf   :  { %v1191_v27 = vadd.f32 %v1158_v50, %v1031_v34 }
 0x3c0   :  { %v904_v19 = vpop.permute.xlu1 %903 }
 0x3c1   :  { %v936_v11 = vadd.f32 %v904_v19, %v776_v52  ;;  %v1514_v19 = vand.u32 127, %v1513_v40  ;;  %v1351_v41 = vadd.f32 %v1318_v17, %v1191_v27 }
 0x3c3   :  { %v1032_v29 = vadd.f32 %v1016_v10, %v936_v11  ;;  %v1511_v9 = vadd.f32 %v1478_v36, %v1351_v41  ;;  %vm1518_vm2 = vcmp.ge.s32.totalorder %v1514_v19, %v1517_v61  ;;  %vm1521_vm3 = vcmp.lt.s32.totalorder %v1514_v19, %v1520_v51 }
 0x3c4   :  { %v1156_v57 = vpop.permute.xlu1 %1155  ;;  %vm1522_vm4 = vmand %vm1518_vm2, %vm1521_vm3 }
 0x3c5   :  { %v1190_v14 = vadd.f32 %v1156_v57, %v1030_v16  ;;  %v1607_v57 = vld [vmem:[%s3495_s4] sm:$0xff] }
 0x3c6   :  { %v1898_v6 = vpack.c.bf16 %v1608_v55, %v1607_v57 }
 0x3c8   :  { %v1472_v1 = vpop.permute.xlu1 %1471 }
 0x3c9   :  { %v1508_v49 = vadd.f32 %v1472_v1, %v1348_v37  ;;  %v1773_v37 = vld [vmem:[%s3496_s5] ss:$0 sm:$0xff] }
 0x3cb   :  { %v1889_v22 = vpack.c.bf16 %v1508_v49, %v1507_v13  ;;  %v1776_v13 = vld [vmem:[%s3496_s5 + $0x2] ss:$0 sm:$0xff] }
 0x3cc   :  { %v1316_v46 = vpop.permute.xlu1 %1315 }
 0x3cd   :  { %1890 = vmatpush3.bf16.msra.mxu1 %v1889_v22  ;;  %v1350_v62 = vadd.f32 %v1316_v46, %v1190_v14 }
 0x3ce   :  { %1891 = vmatprep.subr.bf16.mxu1 %v3581_v35 }
 0x3d0   :  { %v1160_v44 = vpop.permute.xlu1 %1159 }
 0x3d1   :  { %v1192_v21 = vadd.f32 %v1160_v44, %v1032_v29 }
 0x3d4   :  { %v1476_v54 = vpop.permute.xlu1 %1475 }
 0x3d5   :  { %v1510_v48 = vadd.f32 %v1476_v54, %v1350_v62 }
 0x3d7   :  { %v1892_v31 = vpack.c.bf16 %v1510_v48, %v1509_v26 }
 0x3d8   :  { %v1320_v33 = vpop.permute.xlu1 %1319 }
 0x3d9   :  { %1893 = vmatpush3.bf16.msra.mxu1 %v1892_v31  ;;  %v1352_v7 = vadd.f32 %v1320_v33, %v1192_v21 }
 0x3da   :  { %1894 = vmatprep.subr.bf16.mxu1 %v3581_v35 }
 0x3dc   :  { %v1480_v28 = vpop.permute.xlu1 %1479 }
 0x3dd   :  { %v1512_v3 = vadd.f32 %v1480_v28, %v1352_v7 }
 0x3df   :  { %v1895_v2 = vpack.c.bf16 %v1512_v3, %v1511_v9 }
 0x3e1   :  { %1896 = vmatpush3.bf16.msra.mxu1 %v1895_v2 }
 0x3e2   :  { %1897 = vmatprep.subr.bf16.mxu1 %v3581_v35 }
 0x3e4   :  { %1833 = vmatmul.mubr.msk.f32.vlgmr.msra.gmra.mrb[0].mxu1 %vm1522_vm4, %v2114_v47 }
 0x3e5   :  { %1899 = vmatpush3.bf16.msra.mxu1 %v1898_v6  ;;  %1843 = vmatprep.mubr.msk.f32.mxu1 %vm2112_vm1, %v2113_v39  ;;  %v1775_v39 = vld [vmem:[%s3496_s5 + $0x1] ss:$0 sm:$0xff]  ;;  %s2116_s5 = smov [#allocation2]  }
 0x3e6   :  { %1900 = vmatprep.subr.bf16.mxu1 %v3581_v35  ;;  %s1733_s15 = sshll.u32 %s2116_s5, 4  ;;  %s1734_s15 = int_to_ptr.vmem [resolvable:$true] %s1733_s15 }
 0x3e7   :  { %s2052_s16 = scalar_lea.vmem %s1734_s15, 32  ;;  %p2057_p1 = scmp.lt.s32.totalorder %s1734_s15, %s1734_s15 }
 0x3e8   :  { %p2053_p0 = scmp.ne.s32.totalorder %s1734_s15, %s2052_s16  ;;  %p2058_p2 = scmp.lt.s32.totalorder %s2052_s16, %s2052_s16 }
 0x3e9   :  { %1902 = vmatpush3.bf16.msra.mxu1 %v1901_v63 }
 0x3ea   :  { %p2059_p3 = por %p2058_p2, %p2057_p1 }
 0x3ec   :  { %p2060_p4 = pnand %p2059_p3, %p2053_p0 }
 0x4b7   :  { %v1595_v50 = vpop.f32.mrb[0].mxu1 }
 0x4b8   :  { %v1596_v35 = vadd.f32 %v1773_v37, %v1595_v50  ;;  %v1834_v1 = vpop.f32.mrb[1].mxu1 }
 0x4ba   :  { %vm1599_vm5 = vcmp.gt.f32.partialorder %v1596_v35, 0.0  ;;  %v1605_v58 = vmul.f32 %v1775_v39, %v1596_v35 }
 0x4bc   :  { %v1606_v43 = vsel %vm1599_vm5, %v1596_v35, %v1605_v58 }
 0x4bd   :  { %1844 = vmatmul.mubr.msk.f32.vlgmr.msra.gmra.mrb[2].mxu1 %vm1616_vm6, %v1606_v43 }
 0x590   :  { %v1686_v49 = vpop.f32.mrb[2].mxu1 }
 0x591   :  { %v1687_v32 = vadd.f32 %v1776_v13, %v1686_v49  ;;  %v1845_v22 = vpop.f32.mrb[3].mxu1 }
 0x593   :  { %v1705_v46 = vsel %vm1704_vm7, %v1687_v32, -inf  ;;  %v1691_v12 = vsel %vm1690_vm8, %v1687_v32, -inf }
 0x594   :  { %1706 = vmax.xlane.f32.xlu0 %v1705_v46 }
 0x621   :  { %v1707_v0 = vpop.xlane.xlu0 %1706 }
 0x622   :  { %v1708_v18 = vsub.f32 %v1687_v32, %v1707_v0 }
 0x624   :  { %v1709_v59 = vmul.f32 1.442695, %v1708_v18 }
 0x626   :  { %2044 = vpow2.f32 %v1709_v59 }
 0x630   :  { %v2045_v4 = vpop.eup %2044 }
 0x631   :  { %1712 = vrot.lane.b32.xlu1 %v2045_v4, %s2115_s14 }
 0x655   :  { %1692 = vmax.xlane.f32.xlu1 %v1691_v12 }
 0x6a3   :  { %v1713_v45 = vpop.permute.xlu1 %1712 }
 0x6a4   :  { %v1716_v42 = vsel %vm1715_vm9, %v1713_v45, 0.0 }
 0x6a5   :  { %1717 = vadd.xlane.f32.xlu0 %v1716_v42 }
 0x6e2   :  { %v1693_v24 = vpop.xlane.xlu1 %1692 }
 0x6e3   :  { %v1694_v40 = vsub.f32 %v1687_v32, %v1693_v24 }
 0x6e5   :  { %v1695_v53 = vmul.f32 1.442695, %v1694_v40 }
 0x6e7   :  { %2046 = vpow2.f32 %v1695_v53 }
 0x6f1   :  { %v2047_v8 = vpop.eup %2046 }
 0x6f2   :  { %v1697_v16 = vsel %vm1690_vm8, %v2047_v8, 0.0 }
 0x6f3   :  { %1698 = vadd.xlane.f32.xlu0 %v1697_v16 }
 0x732   :  { %v1718_v44 = vpop.xlane.xlu0 %1717 }
 0x733   :  { %2048 = vlog2.f32 %v1718_v44 }
 0x73d   :  { %v2049_v38 = vpop.eup %2048 }
 0x73e   :  { %v1720_v52 = vmul.f32 0.6931472, %v2049_v38 }
 0x740   :  { %v1721_v14 = vsub.f32 %v1708_v18, %v1720_v52 }
 0x742   :  { %1723 = vrot.lane.b32.xlu0 %v1721_v14, %s2115_s14 }
 0x780   :  { %v1699_v20 = vpop.xlane.xlu0 %1698 }
 0x781   :  { %2050 = vlog2.f32 %v1699_v20 }
 0x78b   :  { %v2051_v30 = vpop.eup %2050 }
 0x78c   :  { %v1701_v5 = vmul.f32 0.6931472, %v2051_v30 }
 0x78e   :  { %v1702_v11 = vsub.f32 %v1694_v40, %v1701_v5 }
 0x790   :  { %1703 = vst.msk [vmem:[#allocation2] sm:$0x3] %vm1690_vm8, %v1702_v11 }
 0x791   :  { %2063 = shalt.err (!%p2060_p4)
}
 0x792   :  { %s2064_s20 = scalar_lea.hbm %s3497_s6, 32 }
 0x793   :  { %p2065_p5 = scmp.ne.s32.totalorder %s3497_s6, %s2064_s20  ;;  %p2068_p6 = scmp.lt.u32.totalorder %s2064_s20, %s3497_s6 }
 0x795   :  { %p2070_p7 = pnand %p2068_p6, %p2065_p5 }
 0x797   :  { %2073 = shalt.err (!%p2070_p7)
}
 0x798   :  { %1736 = dma.vmem_to_hbm [thread:$0]  %s1734_s15, 32, %s3497_s6, [#allocation3]  }
 0x799   :  { %s2117_s26 = smov [#allocation4]  }
 0x79a   :  { %s1743_s27 = sshll.u32 %s2117_s26, 4  ;;  %s1744_s27 = int_to_ptr.vmem [resolvable:$true] %s1743_s27 }
 0x79b   :  { %s2074_s3 = scalar_lea.vmem %s1744_s27, 32  ;;  %p2079_p9 = scmp.lt.s32.totalorder %s1744_s27, %s1744_s27 }
 0x79c   :  { %p2075_p8 = scmp.ne.s32.totalorder %s1744_s27, %s2074_s3  ;;  %p2080_p10 = scmp.lt.s32.totalorder %s2074_s3, %s2074_s3 }
 0x79e   :  { %p2081_p11 = por %p2080_p10, %p2079_p9 }
 0x7a0   :  { %p2082_p12 = pnand %p2081_p11, %p2075_p8 }
 0x7b4   :  { %v1724_v62 = vpop.permute.xlu0 %1723 }
 0x7b5   :  { %1726 = vst.msk [vmem:[#allocation4] sm:$0x3] %vm1715_vm9, %v1724_v62 }
 0x7b6   :  { %2085 = shalt.err (!%p2082_p12)
}
 0x7b7   :  { %s2086_s18 = scalar_lea.hbm %s3498_s7, 32 }
 0x7b8   :  { %p2087_p13 = scmp.ne.s32.totalorder %s3498_s7, %s2086_s18  ;;  %p2090_p0 = scmp.lt.u32.totalorder %s2086_s18, %s3498_s7 }
 0x7ba   :  { %p2092_p1 = pnand %p2090_p0, %p2087_p13 }
 0x7bc   :  { %2095 = shalt.err (!%p2092_p1)
}
 0x7bd   :  { %1746 = dma.vmem_to_hbm [thread:$0]  %s1744_s27, 32, %s3498_s7, [#allocation5]  }
 0x7be   :  { %2096 = dma.done.wait [#allocation3], 32  }
 0x7bf   :  { %2097 = vsyncadd [#allocation3], 4294967264 }
 0x7c0   :  { %2098 = dma.done.wait [#allocation5], 32  }
 0x7c1   :  { %2099 = vsyncadd [#allocation5], 4294967264 }
 0x7c2   :  { %1753 = vsyncpa [#allocation3], 1 }
 0x7c3   :  { %1754 = vsyncpa [#allocation5], 1 }

</bundles_post_ra>
